<compile_context>
chip_gen: v5e
topology: v5e:2x2
jax: 0.10.0
libtpu: 0.0.40
codegen_flags: <defaults>
</compile_context>

<pallas_src>
import functools

import numpy as np

import jax
import jax.numpy as jnp
from jax.experimental import pallas as pl
from jax.experimental.pallas import tpu as pltpu

_VMEM_LIMIT = 32 * 1024 * 1024


def _round_up(x, m):
    return ((x + m - 1) // m) * m


# ----------------------------------------------------------------------------
# Kernel 1 (picture path): fully fused conv1+conv2+conv3+flatten+h1+head.
#   x1_ref : (4, TB*PB1, K1)  conv1 operand, phase-major, tap-concat along K
#   w*/b*  : pre-packed weights / f32 biases (see __init__)
#   o_ref  : (TB, A_pad)      f32, lane-dense
# ----------------------------------------------------------------------------
def _picture_kernel(x1_ref, w1_ref, b1_ref, w2_ref, b2_ref, w3_ref, b3_ref,
                    wh1_ref, bh1_ref, whd_ref, bhd_ref, o_ref,
                    *, tb, pb1, m2p, m3p, wq2, oh3, ow3, cd):
    # ---- conv1: one K=4*taps matmul per phase over the whole batch tile -----
    y1 = jnp.concatenate(
        [jnp.maximum(
            jnp.dot(x1_ref[p], w1_ref[...],
                    preferred_element_type=jnp.float32) + b1_ref[...], 0.0)
         for p in range(4)], axis=-1).astype(cd)            # (tb*pb1, 128)

    # ---- conv2: tap-concat operand (K=512), batch folded into M -------------
    ops2 = []
    for b in range(tb):
        base = b * pb1
        slabs = [y1[base + i2 * wq2 + j2: base + i2 * wq2 + j2 + m2p, :]
                 for i2 in range(2) for j2 in range(2)]
        ops2.append(jnp.concatenate(slabs, axis=-1))        # (m2p, 512)
    op2 = jnp.concatenate(ops2, axis=0)                     # (tb*m2p, 512)
    y2 = jnp.maximum(
        jnp.dot(op2, w2_ref[...], preferred_element_type=jnp.float32)
        + b2_ref[...], 0.0).astype(cd)                      # (tb*m2p, 64)

    # ---- conv3: tap-concat operand (K=576) -----------------------------------
    ops3 = []
    for b in range(tb):
        base = b * m2p
        slabs = [y2[base + ki * wq2 + kj: base + ki * wq2 + kj + m3p, :]
                 for ki in range(3) for kj in range(3)]
        ops3.append(jnp.concatenate(slabs, axis=-1))        # (m3p, 576)
    op3 = jnp.concatenate(ops3, axis=0)                     # (tb*m3p, 576)
    y3 = jnp.maximum(
        jnp.dot(op3, w3_ref[...], preferred_element_type=jnp.float32)
        + b3_ref[...], 0.0).astype(cd)                      # (tb*m3p, 64)

    # ---- flatten (position-major, matches pre-permuted h1 weight) -----------
    flats = []
    for b in range(tb):
        base = b * m3p
        rows = [y3[base + o3 * wq2 + ww: base + o3 * wq2 + ww + 1, :]
                for o3 in range(oh3) for ww in range(ow3)]
        flats.append(jnp.concatenate(rows, axis=-1))        # (1, flat)
    h_in = jnp.concatenate(flats, axis=0)                   # (tb, flat)

    # ---- h1 + head (f32 accumulation / bias / tanh) --------------------------
    h = jnp.maximum(
        jnp.dot(h_in, wh1_ref[...], preferred_element_type=jnp.float32)
        + bh1_ref[...], 0.0).astype(cd)
    out = jnp.tanh(
        jnp.dot(h, whd_ref[...], preferred_element_type=jnp.float32)
        + bhd_ref[...])
    o_ref[...] = out.astype(o_ref.dtype)


# ----------------------------------------------------------------------------
# Kernel 2 (vector path): fused 3-layer MLP, intermediates stay in VMEM/vregs.
# ----------------------------------------------------------------------------
def _mlp_kernel(x_ref, *refs, acts, cd):
    o_ref = refs[-1]
    wb = refs[:-1]
    h = x_ref[...]
    for li, act in enumerate(acts):
        w = wb[2 * li][...]
        b = wb[2 * li + 1][...]
        y = jnp.dot(h.astype(cd), w, preferred_element_type=jnp.float32) + b
        h = jnp.maximum(y, 0.0) if act == "relu" else jnp.tanh(y)
    o_ref[...] = h.astype(o_ref.dtype)


# ----------------------------------------------------------------------------
# The module
# ----------------------------------------------------------------------------
class StateAdaptiveActorPallas:
    def __init__(self, state_shape, action_size, hidden_size=256, key=None,
                 compute_dtype=jnp.bfloat16):
        assert isinstance(state_shape, tuple)
        assert len(state_shape) in (1, 3)
        self.state_shape = state_shape
        self.action_size = action_size
        self.hidden_size = hidden_size
        self.is_state_picture = len(state_shape) == 3
        self.compute_dtype = compute_dtype

        if key is None:
            key = jax.random.PRNGKey(0)
        ks = jax.random.split(key, 10)

        def init(k, shape, scale=0.05):
            return (scale * jax.random.normal(k, shape)).astype(jnp.float32)

        # --- PyTorch-layout parameters (used by the pure-JAX reference) ------
        tp = {}
        if self.is_state_picture:
            C, H, W = state_shape
            tp["c1_w"] = init(ks[0], (32, C, 8, 8));   tp["c1_b"] = init(ks[1], (32,))
            tp["c2_w"] = init(ks[2], (64, 32, 4, 4));  tp["c2_b"] = init(ks[3], (64,))
            tp["c3_w"] = init(ks[4], (64, 64, 3, 3));  tp["c3_b"] = init(ks[5], (64,))
            oh1, ow1 = (H - 8) // 4 + 1, (W - 8) // 4 + 1
            oh2, ow2 = (oh1 - 4) // 2 + 1, (ow1 - 4) // 2 + 1
            oh3, ow3 = oh2 - 2, ow2 - 2
            assert oh3 >= 1 and ow3 >= 1, "picture too small for the conv stack"
            flat = 64 * oh3 * ow3
        else:
            (D,) = state_shape
            tp["s_w"] = init(ks[0], (hidden_size, D)); tp["s_b"] = init(ks[1], (hidden_size,))
            flat = hidden_size
        tp["h1_w"] = init(ks[6], (hidden_size, flat));        tp["h1_b"] = init(ks[7], (hidden_size,))
        tp["hd_w"] = init(ks[8], (action_size, hidden_size)); tp["hd_b"] = init(ks[9], (action_size,))
        self.torch_params = tp
        self.flat = flat

        # --- kernel-ready parameters: every reorder / transpose / pad / cast
        #     is done ONCE here instead of per forward pass -------------------
        cd = compute_dtype
        Hp = _round_up(hidden_size, 128)     # lane-dense hidden width
        Ap = _round_up(action_size, 128)     # lane-dense head width
        self._hidden_pad, self._action_pad = Hp, Ap
        kp = {}

        def pad2(w, rows, cols):
            return jnp.pad(w, ((0, rows - w.shape[0]), (0, cols - w.shape[1])))

        if self.is_state_picture:
            C, H, W = state_shape
            hq1, wq1 = H // 4, W // 4                 # s2d grid of the raw input
            WQ2 = ow2 + 1                             # conv1 quotient grid (per phase)
            HQ2 = oh2 + 1
            m3p = _round_up((oh3 - 1) * WQ2 + ow3, 8)
            m2p = _round_up(max(oh2 * WQ2, m3p + 2 * WQ2 + 2), 8)
            pb1 = _round_up(max(HQ2 * WQ2, m2p + WQ2 + 1), 8)
            self._geom = dict(oh3=oh3, ow3=ow3, hq1=hq1, wq1=wq1,
                              wq2=WQ2, pb1=pb1, m2p=m2p, m3p=m3p)

            # conv1 weight: taps (i1,j1) concatenated along K, per-tap channel
            # order = space-to-depth order (si, sj, cin).  K1 = 4*16*C.
            w1 = tp["c1_w"].reshape(32, C, 2, 4, 2, 4)         # (co,ci,i1,si,j1,sj)
            w1 = w1.transpose(2, 4, 3, 5, 1, 0).reshape(64 * C, 32)
            kp["w1"] = w1.astype(cd)
            kp["b1"] = tp["c1_b"].reshape(1, 32).astype(jnp.float32)

            # conv2 weight: (tap i2,j2) x (phase sh,sw) x cin along K (=512)
            w2 = tp["c2_w"].reshape(64, 32, 2, 2, 2, 2)        # (co,ci,i2,sh,j2,sw)
            w2 = w2.transpose(2, 4, 3, 5, 1, 0).reshape(512, 64)
            kp["w2"] = w2.astype(cd)
            kp["b2"] = tp["c2_b"].reshape(1, 64).astype(jnp.float32)

            # conv3 weight: (tap ki,kj) x cin along K (=576)
            w3 = tp["c3_w"].transpose(2, 3, 1, 0).reshape(576, 64)
            kp["w3"] = w3.astype(cd)
            kp["b3"] = tp["c3_b"].reshape(1, 64).astype(jnp.float32)

            # h1 weight: columns permuted NCHW-flatten -> position-major flatten
            q_of_p = jnp.arange(flat).reshape(64, oh3, ow3).transpose(1, 2, 0).reshape(-1)
            kp["h1_w"] = pad2(tp["h1_w"][:, q_of_p].T, flat, Hp).astype(cd)
            kp["h1_b"] = jnp.pad(tp["h1_b"], (0, Hp - hidden_size)
                                 ).reshape(1, Hp).astype(jnp.float32)

            # gather index (phase, local quotient row, conv1 tap) -> s2d grid row
            gidx = np.zeros((4, pb1, 4), np.int32)
            for p in range(4):
                sh, sw = p // 2, p % 2
                for r in range(pb1):
                    if r < HQ2 * WQ2:
                        hq, wq = r // WQ2, r % WQ2
                    else:
                        hq, wq = 0, 0                 # junk rows, never consumed
                    for t in range(4):
                        i1, j1 = t // 2, t % 2
                        gidx[p, r, t] = (2 * hq + sh + i1) * wq1 + (2 * wq + sw + j1)
            self._gidx = jnp.asarray(gidx.reshape(-1))
        else:
            (D,) = state_shape
            Dp = _round_up(D, 128)                    # lane-dense input features
            self._d_pad = Dp
            kp["s_w"] = pad2(tp["s_w"].T, Dp, Hp).astype(cd)
            kp["s_b"] = jnp.pad(tp["s_b"], (0, Hp - hidden_size)
                                ).reshape(1, Hp).astype(jnp.float32)
            kp["h1_w"] = pad2(tp["h1_w"].T, Hp, Hp).astype(cd)
            kp["h1_b"] = jnp.pad(tp["h1_b"], (0, Hp - hidden_size)
                                 ).reshape(1, Hp).astype(jnp.float32)
        kp["hd_w"] = pad2(tp["hd_w"].T, Hp, Ap).astype(cd)
        kp["hd_b"] = jnp.pad(tp["hd_b"], (0, Ap - action_size)
                             ).reshape(1, Ap).astype(jnp.float32)
        self.kernel_params = kp

    # ------------------------------------------------------------ picture path
    def _forward_picture(self, x):
        kp, g, cd = self.kernel_params, self._geom, self.compute_dtype
        C, H, W = self.state_shape
        B = x.shape[0]
        tb = min(B, 8)
        b_pad = _round_up(B, tb)
        if b_pad != B:
            x = jnp.pad(x, ((0, b_pad - B), (0, 0), (0, 0), (0, 0)))
        x = x.astype(cd)                              # halve s2d / DMA bytes (bf16)
        hq1, wq1, pb1 = g["hq1"], g["wq1"], g["pb1"]
        k1 = 64 * C

        # single combined NCHW -> space-to-depth transpose (channel order si,sj,cin)
        xs = x[:, :, :hq1 * 4, :wq1 * 4].reshape(b_pad, C, hq1, 4, wq1, 4)
        xs = xs.transpose(0, 2, 4, 3, 5, 1).reshape(b_pad, hq1 * wq1, 16 * C)
        # one gather builds the tap-concatenated, phase-grouped conv1 operand
        x1 = jnp.take(xs, self._gidx, axis=1).reshape(b_pad, 4, pb1, k1)
        x1 = x1.transpose(1, 0, 2, 3).reshape(4, b_pad * pb1, k1)

        Hp, Ap = self._hidden_pad, self._action_pad
        flops = 2 * b_pad * (4 * pb1 * k1 * 32 + g["m2p"] * 512 * 64
                             + g["m3p"] * 576 * 64 + self.flat * Hp + Hp * Ap)
        bytes_accessed = (x1.size * x1.dtype.itemsize
                          + sum(v.size * v.dtype.itemsize for v in kp.values())
                          + b_pad * Ap * 4)
        kernel = functools.partial(
            _picture_kernel, tb=tb, pb1=pb1, m2p=g["m2p"], m3p=g["m3p"],
            wq2=g["wq2"], oh3=g["oh3"], ow3=g["ow3"], cd=cd)
        full2d = lambda i: (0, 0)
        out = pl.pallas_call(
            kernel,
            out_shape=jax.ShapeDtypeStruct((b_pad, Ap), jnp.float32),
            grid=(b_pad // tb,),
            in_specs=[
                pl.BlockSpec((4, tb * pb1, k1), lambda i: (0, i, 0)),
                pl.BlockSpec(kp["w1"].shape, full2d),
                pl.BlockSpec(kp["b1"].shape, full2d),
                pl.BlockSpec(kp["w2"].shape, full2d),
                pl.BlockSpec(kp["b2"].shape, full2d),
                pl.BlockSpec(kp["w3"].shape, full2d),
                pl.BlockSpec(kp["b3"].shape, full2d),
                pl.BlockSpec(kp["h1_w"].shape, full2d),
                pl.BlockSpec(kp["h1_b"].shape, full2d),
                pl.BlockSpec(kp["hd_w"].shape, full2d),
                pl.BlockSpec(kp["hd_b"].shape, full2d),
            ],
            out_specs=pl.BlockSpec((tb, Ap), lambda i: (i, 0)),
            compiler_params=pltpu.CompilerParams(
                dimension_semantics=("parallel",),
                vmem_limit_bytes=_VMEM_LIMIT),
            cost_estimate=pl.CostEstimate(flops=int(flops),
                                          transcendentals=int(b_pad * Ap),
                                          bytes_accessed=int(bytes_accessed)),
        )(x1, kp["w1"], kp["b1"], kp["w2"], kp["b2"], kp["w3"], kp["b3"],
          kp["h1_w"], kp["h1_b"], kp["hd_w"], kp["hd_b"])
        return out[:B, :self.action_size]

    # ------------------------------------------------------------- vector path
    def _forward_vector(self, x):
        kp, cd = self.kernel_params, self.compute_dtype
        B, D = x.shape
        Dp, Hp, Ap = self._d_pad, self._hidden_pad, self._action_pad
        x = x.astype(cd)
        if Dp != D:
            x = jnp.pad(x, ((0, 0), (0, Dp - D)))
        if B <= 8:
            tm = B
        else:
            tm = min(256, _round_up((B + 1) // 2, 8))   # >=2 steps for v7x megacore
        m_pad = _round_up(B, tm)
        if m_pad != B:
            x = jnp.pad(x, ((0, m_pad - B), (0, 0)))

        layers = [(kp["s_w"], kp["s_b"]), (kp["h1_w"], kp["h1_b"]),
                  (kp["hd_w"], kp["hd_b"])]
        acts = ("relu", "relu", "tanh")
        full2d = lambda i: (0, 0)
        in_specs = [pl.BlockSpec((tm, Dp), lambda i: (i, 0))]
        args = [x]
        flops = 0
        for w, b in layers:
            in_specs += [pl.BlockSpec(w.shape, full2d), pl.BlockSpec(b.shape, full2d)]
            args += [w, b]
            flops += 2 * m_pad * w.shape[0] * w.shape[1]
        bytes_accessed = (x.size * x.dtype.itemsize + m_pad * Ap * 4
                          + sum(a.size * a.dtype.itemsize for a in args[1:]))
        out = pl.pallas_call(
            functools.partial(_mlp_kernel, acts=acts, cd=cd),
            out_shape=jax.ShapeDtypeStruct((m_pad, Ap), jnp.float32),
            grid=(m_pad // tm,),
            in_specs=in_specs,
            out_specs=pl.BlockSpec((tm, Ap), lambda i: (i, 0)),
            compiler_params=pltpu.CompilerParams(
                dimension_semantics=("parallel",),
                vmem_limit_bytes=_VMEM_LIMIT),
            cost_estimate=pl.CostEstimate(flops=int(flops),
                                          transcendentals=int(m_pad * Ap),
                                          bytes_accessed=int(bytes_accessed)),
        )(*args)
        return out[:B, :self.action_size]

    # ---------------------------------------------------------------- forward
    def __call__(self, state):
        x = jnp.asarray(state, jnp.float32)
        if x.ndim == len(self.state_shape):              # make_it_batched
            x = x[None]
        if self.is_state_picture:
            return self._forward_picture(x)
        return self._forward_vector(x)

    # --- pure-JAX reference (mirrors PyTorch exactly) ------------------------
    def reference(self, state):
        tp = self.torch_params
        x = jnp.asarray(state, jnp.float32)
        if x.ndim == len(self.state_shape):
            x = x[None]
        if self.is_state_picture:
            dn = ("NCHW", "OIHW", "NCHW")
            for w, b, s in ((tp["c1_w"], tp["c1_b"], 4),
                            (tp["c2_w"], tp["c2_b"], 2),
                            (tp["c3_w"], tp["c3_b"], 1)):
                x = jax.lax.conv_general_dilated(x, w, (s, s), "VALID",
                                                 dimension_numbers=dn)
                x = jax.nn.relu(x + b[None, :, None, None])
            x = jax.nn.relu(x)
            x = x.reshape(x.shape[0], -1)
        else:
            x = jax.nn.relu(x @ tp["s_w"].T + tp["s_b"])
        x = jax.nn.relu(x @ tp["h1_w"].T + tp["h1_b"])
        return jnp.tanh(x @ tp["hd_w"].T + tp["hd_b"])


if __name__ == "__main__":
    root = jax.random.PRNGKey(0)
    k_params, k_pic, k_vec, k_params_v = jax.random.split(root, 4)

    # ---- picture path, f32 compute: strict check vs the pure-JAX reference --
    actor_pic = StateAdaptiveActorPallas((4, 44, 44), action_size=6,
                                         hidden_size=32, key=k_params,
                                         compute_dtype=jnp.float32)
    x_pic = jax.random.normal(k_pic, (2, 4, 44, 44), jnp.float32)
    out_pic = jax.jit(actor_pic.__call__)(x_pic)
    jax.block_until_ready(out_pic)
    ref_pic = actor_pic.reference(x_pic)
    assert out_pic.shape == (2, 6)
    assert jnp.allclose(out_pic, ref_pic, atol=1e-3, rtol=1e-3), "picture path mismatch"

    # ---- vector path, f32 compute --------------------------------------------
    actor_vec = StateAdaptiveActorPallas((16,), action_size=6,
                                         hidden_size=32, key=k_params_v,
                                         compute_dtype=jnp.float32)
    x_vec = jax.random.normal(k_vec, (2, 16), jnp.float32)
    out_vec = jax.jit(actor_vec.__call__)(x_vec)
    jax.block_until_ready(out_vec)
    ref_vec = actor_vec.reference(x_vec)
    assert out_vec.shape == (2, 6)
    assert jnp.allclose(out_vec, ref_vec, atol=1e-3, rtol=1e-3), "vector path mismatch"

    # ---- default (bf16) compute: MXU-peak feed on v6e/v7x, f32 accumulation --
    actor_bf16 = StateAdaptiveActorPallas((4, 44, 44), action_size=6,
                                          hidden_size=32, key=k_params)
    out_bf16 = jax.jit(actor_bf16.__call__)(x_pic)
    jax.block_until_ready(out_bf16)
    assert out_bf16.shape == (2, 6)
    assert jnp.allclose(out_bf16, ref_pic, atol=5e-2, rtol=5e-2), "bf16 path mismatch"

    print("KERNEL_OK")
</pallas_src>

<mosaic_0001>
module attributes {stable_mosaic.version = 11 : i64} {
  func.func @_picture_kernel(%arg0: i32, %arg1: memref<4x64x256xf32, #tpu.memory_space<vmem>>, %arg2: memref<256x32xf32, #tpu.memory_space<vmem>>, %arg3: memref<1x32xf32, #tpu.memory_space<vmem>>, %arg4: memref<512x64xf32, #tpu.memory_space<vmem>>, %arg5: memref<1x64xf32, #tpu.memory_space<vmem>>, %arg6: memref<576x64xf32, #tpu.memory_space<vmem>>, %arg7: memref<1x64xf32, #tpu.memory_space<vmem>>, %arg8: memref<256x128xf32, #tpu.memory_space<vmem>>, %arg9: memref<1x128xf32, #tpu.memory_space<vmem>>, %arg10: memref<128x128xf32, #tpu.memory_space<vmem>>, %arg11: memref<1x128xf32, #tpu.memory_space<vmem>>, %arg12: memref<2x128xf32, #tpu.memory_space<vmem>>) attributes {dimension_semantics = [#tpu.dimension_semantics<parallel>], iteration_bounds = array<i64: 1>, scalar_prefetch = 0 : i64, scratch_operands = 0 : i64, tpu.core_type = #tpu.core_type<tc>, window_params = [{transform_indices = @transform_0, window_bounds = array<i64: 4, 64, 256>}, {pipeline_mode = #tpu.pipeline_mode<synchronous>, transform_indices = @transform_1, window_bounds = array<i64: 256, 32>}, {pipeline_mode = #tpu.pipeline_mode<synchronous>, transform_indices = @transform_2, window_bounds = array<i64: 1, 32>}, {pipeline_mode = #tpu.pipeline_mode<synchronous>, transform_indices = @transform_3, window_bounds = array<i64: 512, 64>}, {pipeline_mode = #tpu.pipeline_mode<synchronous>, transform_indices = @transform_4, window_bounds = array<i64: 1, 64>}, {pipeline_mode = #tpu.pipeline_mode<synchronous>, transform_indices = @transform_5, window_bounds = array<i64: 576, 64>}, {pipeline_mode = #tpu.pipeline_mode<synchronous>, transform_indices = @transform_6, window_bounds = array<i64: 1, 64>}, {pipeline_mode = #tpu.pipeline_mode<synchronous>, transform_indices = @transform_7, window_bounds = array<i64: 256, 128>}, {pipeline_mode = #tpu.pipeline_mode<synchronous>, transform_indices = @transform_8, window_bounds = array<i64: 1, 128>}, {pipeline_mode = #tpu.pipeline_mode<synchronous>, transform_indices = @transform_9, window_bounds = array<i64: 128, 128>}, {pipeline_mode = #tpu.pipeline_mode<synchronous>, transform_indices = @transform_10, window_bounds = array<i64: 1, 128>}, {transform_indices = @transform_11, window_bounds = array<i64: 2, 128>}]} {
    %c0 = arith.constant 0 : index
    %c0_0 = arith.constant 0 : index
    %c0_1 = arith.constant 0 : index
    %0 = vector.load %arg1[%c0, %c0_0, %c0_1] : memref<4x64x256xf32, #tpu.memory_space<vmem>>, vector<1x64x256xf32>
    %1 = vector.shape_cast %0 : vector<1x64x256xf32> to vector<64x256xf32>
    %c0_2 = arith.constant 0 : index
    %c0_3 = arith.constant 0 : index
    %2 = vector.load %arg2[%c0_2, %c0_3] : memref<256x32xf32, #tpu.memory_space<vmem>>, vector<256x32xf32>
    %cst = arith.constant dense<0.000000e+00> : vector<64x32xf32>
    %3 = tpu.matmul %1, %2, %cst {dimension_numbers = #tpu.dot_dimension_numbers<[1], [0], [0], [1], [0, 0, 1, 1], [], []>} : vector<64x256xf32>, vector<256x32xf32>, vector<64x32xf32> -> vector<64x32xf32>
    %c0_4 = arith.constant 0 : index
    %c0_5 = arith.constant 0 : index
    %4 = vector.load %arg3[%c0_4, %c0_5] : memref<1x32xf32, #tpu.memory_space<vmem>>, vector<1x32xf32>
    %5 = vector.broadcast %4 : vector<1x32xf32> to vector<64x32xf32>
    %6 = arith.addf %3, %5 : vector<64x32xf32>
    %cst_6 = arith.constant 0.000000e+00 : f32
    %7 = vector.broadcast %cst_6 : f32 to vector<64x32xf32>
    %8 = arith.maximumf %6, %7 : vector<64x32xf32>
    %c1 = arith.constant 1 : index
    %c0_7 = arith.constant 0 : index
    %c0_8 = arith.constant 0 : index
    %9 = vector.load %arg1[%c1, %c0_7, %c0_8] : memref<4x64x256xf32, #tpu.memory_space<vmem>>, vector<1x64x256xf32>
    %10 = vector.shape_cast %9 : vector<1x64x256xf32> to vector<64x256xf32>
    %c0_9 = arith.constant 0 : index
    %c0_10 = arith.constant 0 : index
    %11 = vector.load %arg2[%c0_9, %c0_10] : memref<256x32xf32, #tpu.memory_space<vmem>>, vector<256x32xf32>
    %cst_11 = arith.constant dense<0.000000e+00> : vector<64x32xf32>
    %12 = tpu.matmul %10, %11, %cst_11 {dimension_numbers = #tpu.dot_dimension_numbers<[1], [0], [0], [1], [0, 0, 1, 1], [], []>} : vector<64x256xf32>, vector<256x32xf32>, vector<64x32xf32> -> vector<64x32xf32>
    %c0_12 = arith.constant 0 : index
    %c0_13 = arith.constant 0 : index
    %13 = vector.load %arg3[%c0_12, %c0_13] : memref<1x32xf32, #tpu.memory_space<vmem>>, vector<1x32xf32>
    %14 = vector.broadcast %13 : vector<1x32xf32> to vector<64x32xf32>
    %15 = arith.addf %12, %14 : vector<64x32xf32>
    %cst_14 = arith.constant 0.000000e+00 : f32
    %16 = vector.broadcast %cst_14 : f32 to vector<64x32xf32>
    %17 = arith.maximumf %15, %16 : vector<64x32xf32>
    %c2 = arith.constant 2 : index
    %c0_15 = arith.constant 0 : index
    %c0_16 = arith.constant 0 : index
    %18 = vector.load %arg1[%c2, %c0_15, %c0_16] : memref<4x64x256xf32, #tpu.memory_space<vmem>>, vector<1x64x256xf32>
    %19 = vector.shape_cast %18 : vector<1x64x256xf32> to vector<64x256xf32>
    %c0_17 = arith.constant 0 : index
    %c0_18 = arith.constant 0 : index
    %20 = vector.load %arg2[%c0_17, %c0_18] : memref<256x32xf32, #tpu.memory_space<vmem>>, vector<256x32xf32>
    %cst_19 = arith.constant dense<0.000000e+00> : vector<64x32xf32>
    %21 = tpu.matmul %19, %20, %cst_19 {dimension_numbers = #tpu.dot_dimension_numbers<[1], [0], [0], [1], [0, 0, 1, 1], [], []>} : vector<64x256xf32>, vector<256x32xf32>, vector<64x32xf32> -> vector<64x32xf32>
    %c0_20 = arith.constant 0 : index
    %c0_21 = arith.constant 0 : index
    %22 = vector.load %arg3[%c0_20, %c0_21] : memref<1x32xf32, #tpu.memory_space<vmem>>, vector<1x32xf32>
    %23 = vector.broadcast %22 : vector<1x32xf32> to vector<64x32xf32>
    %24 = arith.addf %21, %23 : vector<64x32xf32>
    %cst_22 = arith.constant 0.000000e+00 : f32
    %25 = vector.broadcast %cst_22 : f32 to vector<64x32xf32>
    %26 = arith.maximumf %24, %25 : vector<64x32xf32>
    %c3 = arith.constant 3 : index
    %c0_23 = arith.constant 0 : index
    %c0_24 = arith.constant 0 : index
    %27 = vector.load %arg1[%c3, %c0_23, %c0_24] : memref<4x64x256xf32, #tpu.memory_space<vmem>>, vector<1x64x256xf32>
    %28 = vector.shape_cast %27 : vector<1x64x256xf32> to vector<64x256xf32>
    %c0_25 = arith.constant 0 : index
    %c0_26 = arith.constant 0 : index
    %29 = vector.load %arg2[%c0_25, %c0_26] : memref<256x32xf32, #tpu.memory_space<vmem>>, vector<256x32xf32>
    %cst_27 = arith.constant dense<0.000000e+00> : vector<64x32xf32>
    %30 = tpu.matmul %28, %29, %cst_27 {dimension_numbers = #tpu.dot_dimension_numbers<[1], [0], [0], [1], [0, 0, 1, 1], [], []>} : vector<64x256xf32>, vector<256x32xf32>, vector<64x32xf32> -> vector<64x32xf32>
    %c0_28 = arith.constant 0 : index
    %c0_29 = arith.constant 0 : index
    %31 = vector.load %arg3[%c0_28, %c0_29] : memref<1x32xf32, #tpu.memory_space<vmem>>, vector<1x32xf32>
    %32 = vector.broadcast %31 : vector<1x32xf32> to vector<64x32xf32>
    %33 = arith.addf %30, %32 : vector<64x32xf32>
    %cst_30 = arith.constant 0.000000e+00 : f32
    %34 = vector.broadcast %cst_30 : f32 to vector<64x32xf32>
    %35 = arith.maximumf %33, %34 : vector<64x32xf32>
    %36 = tpu.concatenate %8, %17, %26, %35 in 1 : vector<64x32xf32>, vector<64x32xf32>, vector<64x32xf32>, vector<64x32xf32> -> vector<64x128xf32>
    %37 = vector.extract_strided_slice %36 {offsets = [0, 0], sizes = [24, 128], strides = [1, 1]} : vector<64x128xf32> to vector<24x128xf32>
    %38 = vector.extract_strided_slice %36 {offsets = [1, 0], sizes = [24, 128], strides = [1, 1]} : vector<64x128xf32> to vector<24x128xf32>
    %39 = vector.extract_strided_slice %36 {offsets = [5, 0], sizes = [24, 128], strides = [1, 1]} : vector<64x128xf32> to vector<24x128xf32>
    %40 = vector.extract_strided_slice %36 {offsets = [6, 0], sizes = [24, 128], strides = [1, 1]} : vector<64x128xf32> to vector<24x128xf32>
    %41 = tpu.concatenate %37, %38, %39, %40 in 1 : vector<24x128xf32>, vector<24x128xf32>, vector<24x128xf32>, vector<24x128xf32> -> vector<24x512xf32>
    %42 = vector.extract_strided_slice %36 {offsets = [32, 0], sizes = [24, 128], strides = [1, 1]} : vector<64x128xf32> to vector<24x128xf32>
    %43 = vector.extract_strided_slice %36 {offsets = [33, 0], sizes = [24, 128], strides = [1, 1]} : vector<64x128xf32> to vector<24x128xf32>
    %44 = vector.extract_strided_slice %36 {offsets = [37, 0], sizes = [24, 128], strides = [1, 1]} : vector<64x128xf32> to vector<24x128xf32>
    %45 = vector.extract_strided_slice %36 {offsets = [38, 0], sizes = [24, 128], strides = [1, 1]} : vector<64x128xf32> to vector<24x128xf32>
    %46 = tpu.concatenate %42, %43, %44, %45 in 1 : vector<24x128xf32>, vector<24x128xf32>, vector<24x128xf32>, vector<24x128xf32> -> vector<24x512xf32>
    %47 = tpu.concatenate %41, %46 in 0 : vector<24x512xf32>, vector<24x512xf32> -> vector<48x512xf32>
    %c0_31 = arith.constant 0 : index
    %c0_32 = arith.constant 0 : index
    %48 = vector.load %arg4[%c0_31, %c0_32] : memref<512x64xf32, #tpu.memory_space<vmem>>, vector<512x64xf32>
    %cst_33 = arith.constant dense<0.000000e+00> : vector<48x64xf32>
    %49 = tpu.matmul %47, %48, %cst_33 {dimension_numbers = #tpu.dot_dimension_numbers<[1], [0], [0], [1], [0, 0, 1, 1], [], []>} : vector<48x512xf32>, vector<512x64xf32>, vector<48x64xf32> -> vector<48x64xf32>
    %c0_34 = arith.constant 0 : index
    %c0_35 = arith.constant 0 : index
    %50 = vector.load %arg5[%c0_34, %c0_35] : memref<1x64xf32, #tpu.memory_space<vmem>>, vector<1x64xf32>
    %51 = vector.broadcast %50 : vector<1x64xf32> to vector<48x64xf32>
    %52 = arith.addf %49, %51 : vector<48x64xf32>
    %cst_36 = arith.constant 0.000000e+00 : f32
    %53 = vector.broadcast %cst_36 : f32 to vector<48x64xf32>
    %54 = arith.maximumf %52, %53 : vector<48x64xf32>
    %55 = vector.extract_strided_slice %54 {offsets = [0, 0], sizes = [8, 64], strides = [1, 1]} : vector<48x64xf32> to vector<8x64xf32>
    %56 = vector.extract_strided_slice %54 {offsets = [1, 0], sizes = [8, 64], strides = [1, 1]} : vector<48x64xf32> to vector<8x64xf32>
    %57 = vector.extract_strided_slice %54 {offsets = [2, 0], sizes = [8, 64], strides = [1, 1]} : vector<48x64xf32> to vector<8x64xf32>
    %58 = vector.extract_strided_slice %54 {offsets = [5, 0], sizes = [8, 64], strides = [1, 1]} : vector<48x64xf32> to vector<8x64xf32>
    %59 = vector.extract_strided_slice %54 {offsets = [6, 0], sizes = [8, 64], strides = [1, 1]} : vector<48x64xf32> to vector<8x64xf32>
    %60 = vector.extract_strided_slice %54 {offsets = [7, 0], sizes = [8, 64], strides = [1, 1]} : vector<48x64xf32> to vector<8x64xf32>
    %61 = vector.extract_strided_slice %54 {offsets = [10, 0], sizes = [8, 64], strides = [1, 1]} : vector<48x64xf32> to vector<8x64xf32>
    %62 = vector.extract_strided_slice %54 {offsets = [11, 0], sizes = [8, 64], strides = [1, 1]} : vector<48x64xf32> to vector<8x64xf32>
    %63 = vector.extract_strided_slice %54 {offsets = [12, 0], sizes = [8, 64], strides = [1, 1]} : vector<48x64xf32> to vector<8x64xf32>
    %64 = tpu.concatenate %55, %56, %57, %58, %59, %60, %61, %62, %63 in 1 : vector<8x64xf32>, vector<8x64xf32>, vector<8x64xf32>, vector<8x64xf32>, vector<8x64xf32>, vector<8x64xf32>, vector<8x64xf32>, vector<8x64xf32>, vector<8x64xf32> -> vector<8x576xf32>
    %65 = vector.extract_strided_slice %54 {offsets = [24, 0], sizes = [8, 64], strides = [1, 1]} : vector<48x64xf32> to vector<8x64xf32>
    %66 = vector.extract_strided_slice %54 {offsets = [25, 0], sizes = [8, 64], strides = [1, 1]} : vector<48x64xf32> to vector<8x64xf32>
    %67 = vector.extract_strided_slice %54 {offsets = [26, 0], sizes = [8, 64], strides = [1, 1]} : vector<48x64xf32> to vector<8x64xf32>
    %68 = vector.extract_strided_slice %54 {offsets = [29, 0], sizes = [8, 64], strides = [1, 1]} : vector<48x64xf32> to vector<8x64xf32>
    %69 = vector.extract_strided_slice %54 {offsets = [30, 0], sizes = [8, 64], strides = [1, 1]} : vector<48x64xf32> to vector<8x64xf32>
    %70 = vector.extract_strided_slice %54 {offsets = [31, 0], sizes = [8, 64], strides = [1, 1]} : vector<48x64xf32> to vector<8x64xf32>
    %71 = vector.extract_strided_slice %54 {offsets = [34, 0], sizes = [8, 64], strides = [1, 1]} : vector<48x64xf32> to vector<8x64xf32>
    %72 = vector.extract_strided_slice %54 {offsets = [35, 0], sizes = [8, 64], strides = [1, 1]} : vector<48x64xf32> to vector<8x64xf32>
    %73 = vector.extract_strided_slice %54 {offsets = [36, 0], sizes = [8, 64], strides = [1, 1]} : vector<48x64xf32> to vector<8x64xf32>
    %74 = tpu.concatenate %65, %66, %67, %68, %69, %70, %71, %72, %73 in 1 : vector<8x64xf32>, vector<8x64xf32>, vector<8x64xf32>, vector<8x64xf32>, vector<8x64xf32>, vector<8x64xf32>, vector<8x64xf32>, vector<8x64xf32>, vector<8x64xf32> -> vector<8x576xf32>
    %75 = tpu.concatenate %64, %74 in 0 : vector<8x576xf32>, vector<8x576xf32> -> vector<16x576xf32>
    %c0_37 = arith.constant 0 : index
    %c0_38 = arith.constant 0 : index
    %76 = vector.load %arg6[%c0_37, %c0_38] : memref<576x64xf32, #tpu.memory_space<vmem>>, vector<576x64xf32>
    %cst_39 = arith.constant dense<0.000000e+00> : vector<16x64xf32>
    %77 = tpu.matmul %75, %76, %cst_39 {dimension_numbers = #tpu.dot_dimension_numbers<[1], [0], [0], [1], [0, 0, 1, 1], [], []>} : vector<16x576xf32>, vector<576x64xf32>, vector<16x64xf32> -> vector<16x64xf32>
    %c0_40 = arith.constant 0 : index
    %c0_41 = arith.constant 0 : index
    %78 = vector.load %arg7[%c0_40, %c0_41] : memref<1x64xf32, #tpu.memory_space<vmem>>, vector<1x64xf32>
    %79 = vector.broadcast %78 : vector<1x64xf32> to vector<16x64xf32>
    %80 = arith.addf %77, %79 : vector<16x64xf32>
    %cst_42 = arith.constant 0.000000e+00 : f32
    %81 = vector.broadcast %cst_42 : f32 to vector<16x64xf32>
    %82 = arith.maximumf %80, %81 : vector<16x64xf32>
    %83 = vector.extract_strided_slice %82 {offsets = [0, 0], sizes = [1, 64], strides = [1, 1]} : vector<16x64xf32> to vector<1x64xf32>
    %84 = vector.extract_strided_slice %82 {offsets = [1, 0], sizes = [1, 64], strides = [1, 1]} : vector<16x64xf32> to vector<1x64xf32>
    %85 = vector.extract_strided_slice %82 {offsets = [5, 0], sizes = [1, 64], strides = [1, 1]} : vector<16x64xf32> to vector<1x64xf32>
    %86 = vector.extract_strided_slice %82 {offsets = [6, 0], sizes = [1, 64], strides = [1, 1]} : vector<16x64xf32> to vector<1x64xf32>
    %87 = tpu.concatenate %83, %84, %85, %86 in 1 : vector<1x64xf32>, vector<1x64xf32>, vector<1x64xf32>, vector<1x64xf32> -> vector<1x256xf32>
    %88 = vector.extract_strided_slice %82 {offsets = [8, 0], sizes = [1, 64], strides = [1, 1]} : vector<16x64xf32> to vector<1x64xf32>
    %89 = vector.extract_strided_slice %82 {offsets = [9, 0], sizes = [1, 64], strides = [1, 1]} : vector<16x64xf32> to vector<1x64xf32>
    %90 = vector.extract_strided_slice %82 {offsets = [13, 0], sizes = [1, 64], strides = [1, 1]} : vector<16x64xf32> to vector<1x64xf32>
    %91 = vector.extract_strided_slice %82 {offsets = [14, 0], sizes = [1, 64], strides = [1, 1]} : vector<16x64xf32> to vector<1x64xf32>
    %92 = tpu.concatenate %88, %89, %90, %91 in 1 : vector<1x64xf32>, vector<1x64xf32>, vector<1x64xf32>, vector<1x64xf32> -> vector<1x256xf32>
    %93 = tpu.concatenate %87, %92 in 0 : vector<1x256xf32>, vector<1x256xf32> -> vector<2x256xf32>
    %c0_43 = arith.constant 0 : index
    %c0_44 = arith.constant 0 : index
    %94 = vector.load %arg8[%c0_43, %c0_44] : memref<256x128xf32, #tpu.memory_space<vmem>>, vector<256x128xf32>
    %cst_45 = arith.constant dense<0.000000e+00> : vector<2x128xf32>
    %95 = tpu.matmul %93, %94, %cst_45 {dimension_numbers = #tpu.dot_dimension_numbers<[1], [0], [0], [1], [0, 0, 1, 1], [], []>} : vector<2x256xf32>, vector<256x128xf32>, vector<2x128xf32> -> vector<2x128xf32>
    %c0_46 = arith.constant 0 : index
    %c0_47 = arith.constant 0 : index
    %96 = vector.load %arg9[%c0_46, %c0_47] : memref<1x128xf32, #tpu.memory_space<vmem>>, vector<1x128xf32>
    %97 = vector.broadcast %96 : vector<1x128xf32> to vector<2x128xf32>
    %98 = arith.addf %95, %97 : vector<2x128xf32>
    %cst_48 = arith.constant 0.000000e+00 : f32
    %99 = vector.broadcast %cst_48 : f32 to vector<2x128xf32>
    %100 = arith.maximumf %98, %99 : vector<2x128xf32>
    %c0_49 = arith.constant 0 : index
    %c0_50 = arith.constant 0 : index
    %101 = vector.load %arg10[%c0_49, %c0_50] : memref<128x128xf32, #tpu.memory_space<vmem>>, vector<128x128xf32>
    %cst_51 = arith.constant dense<0.000000e+00> : vector<2x128xf32>
    %102 = tpu.matmul %100, %101, %cst_51 {dimension_numbers = #tpu.dot_dimension_numbers<[1], [0], [0], [1], [0, 0, 1, 1], [], []>} : vector<2x128xf32>, vector<128x128xf32>, vector<2x128xf32> -> vector<2x128xf32>
    %c0_52 = arith.constant 0 : index
    %c0_53 = arith.constant 0 : index
    %103 = vector.load %arg11[%c0_52, %c0_53] : memref<1x128xf32, #tpu.memory_space<vmem>>, vector<1x128xf32>
    %104 = vector.broadcast %103 : vector<1x128xf32> to vector<2x128xf32>
    %105 = arith.addf %102, %104 : vector<2x128xf32>
    %106 = math.tanh %105 : vector<2x128xf32>
    %c0_54 = arith.constant 0 : index
    %c0_55 = arith.constant 0 : index
    %107 = vector.load %arg12[%c0_54, %c0_55] : memref<2x128xf32, #tpu.memory_space<vmem>>, vector<2x128xf32>
    tpu.vector_store %arg12[%c0_54, %c0_55], %106 {strides = array<i32>} : memref<2x128xf32, #tpu.memory_space<vmem>>, vector<2x128xf32>,
    return
  }
  func.func @transform_0(%arg0: i32) -> (i32, i32, i32) {
    %c0_i32 = arith.constant 0 : i32
    %c0_i32_0 = arith.constant 0 : i32
    %c0_i32_1 = arith.constant 0 : i32
    return %c0_i32, %arg0, %c0_i32_0 : i32, i32, i32
  }
  func.func @transform_1(%arg0: i32) -> (i32, i32) {
    %c0_i32 = arith.constant 0 : i32
    %c0_i32_0 = arith.constant 0 : i32
    %c0_i32_1 = arith.constant 0 : i32
    return %c0_i32, %c0_i32_0 : i32, i32
  }
  func.func @transform_2(%arg0: i32) -> (i32, i32) {
    %c0_i32 = arith.constant 0 : i32
    %c0_i32_0 = arith.constant 0 : i32
    %c0_i32_1 = arith.constant 0 : i32
    return %c0_i32, %c0_i32_0 : i32, i32
  }
  func.func @transform_3(%arg0: i32) -> (i32, i32) {
    %c0_i32 = arith.constant 0 : i32
    %c0_i32_0 = arith.constant 0 : i32
    %c0_i32_1 = arith.constant 0 : i32
    return %c0_i32, %c0_i32_0 : i32, i32
  }
  func.func @transform_4(%arg0: i32) -> (i32, i32) {
    %c0_i32 = arith.constant 0 : i32
    %c0_i32_0 = arith.constant 0 : i32
    %c0_i32_1 = arith.constant 0 : i32
    return %c0_i32, %c0_i32_0 : i32, i32
  }
  func.func @transform_5(%arg0: i32) -> (i32, i32) {
    %c0_i32 = arith.constant 0 : i32
    %c0_i32_0 = arith.constant 0 : i32
    %c0_i32_1 = arith.constant 0 : i32
    return %c0_i32, %c0_i32_0 : i32, i32
  }
  func.func @transform_6(%arg0: i32) -> (i32, i32) {
    %c0_i32 = arith.constant 0 : i32
    %c0_i32_0 = arith.constant 0 : i32
    %c0_i32_1 = arith.constant 0 : i32
    return %c0_i32, %c0_i32_0 : i32, i32
  }
  func.func @transform_7(%arg0: i32) -> (i32, i32) {
    %c0_i32 = arith.constant 0 : i32
    %c0_i32_0 = arith.constant 0 : i32
    %c0_i32_1 = arith.constant 0 : i32
    return %c0_i32, %c0_i32_0 : i32, i32
  }
  func.func @transform_8(%arg0: i32) -> (i32, i32) {
    %c0_i32 = arith.constant 0 : i32
    %c0_i32_0 = arith.constant 0 : i32
    %c0_i32_1 = arith.constant 0 : i32
    return %c0_i32, %c0_i32_0 : i32, i32
  }
  func.func @transform_9(%arg0: i32) -> (i32, i32) {
    %c0_i32 = arith.constant 0 : i32
    %c0_i32_0 = arith.constant 0 : i32
    %c0_i32_1 = arith.constant 0 : i32
    return %c0_i32, %c0_i32_0 : i32, i32
  }
  func.func @transform_10(%arg0: i32) -> (i32, i32) {
    %c0_i32 = arith.constant 0 : i32
    %c0_i32_0 = arith.constant 0 : i32
    %c0_i32_1 = arith.constant 0 : i32
    return %c0_i32, %c0_i32_0 : i32, i32
  }
  func.func @transform_11(%arg0: i32) -> (i32, i32) {
    %c0_i32 = arith.constant 0 : i32
    %c0_i32_0 = arith.constant 0 : i32
    return %arg0, %c0_i32 : i32, i32
  }
}

</mosaic_0001>

<bundles_post_ra>
// kernel: a_call__.1
= control target key start
LH: loop header
LB: loop body
LE: loop exit
PB: predicated region body
PF: predicated region fallthrough
CT: control target
= control target key end

     0   :  { %s2884_s0 = inlined_call_operand.vmem [shape: f32[4,64,256], index: 0, kind: input, shape index: {}]   ;;  %s2885_s1 = inlined_call_operand.vmem [shape: f32[256,32], index: 1, kind: input, shape index: {}]   ;;  %s2886_s2 = inlined_call_operand.vmem [shape: f32[1,32], index: 2, kind: input, shape index: {}]   ;;  %s2887_s3 = inlined_call_operand.vmem [shape: f32[512,64], index: 3, kind: input, shape index: {}]   ;;  %s2888_s4 = inlined_call_operand.vmem [shape: f32[1,64], index: 4, kind: input, shape index: {}]   ;;  %s2889_s5 = inlined_call_operand.vmem [shape: f32[576,64], index: 5, kind: input, shape index: {}]   ;;  %s2890_s6 = inlined_call_operand.vmem [shape: f32[1,64], index: 6, kind: input, shape index: {}]   ;;  %s2891_s7 = inlined_call_operand.vmem [shape: f32[256,128], index: 7, kind: input, shape index: {}]   ;;  %s2892_s8 = inlined_call_operand.vmem [shape: f32[1,128], index: 8, kind: input, shape index: {}]   ;;  %s2893_s9 = inlined_call_operand.vmem [shape: f32[128,128], index: 9, kind: input, shape index: {}]   ;;  %s2894_s10 = inlined_call_operand.vmem [shape: f32[1,128], index: 10, kind: input, shape index: {}]   ;;  %s2895_s11 = inlined_call_operand.hbm [shape: f32[2,128], index: 11, kind: output, shape index: {}]  }
   0x1   :  { %v1599_v0 = vld [vmem:[%s2885_s1 + $0x78] sm:$0xff]  ;;  %v1604_v1 = vld [vmem:[%s2885_s1 + $0x70] sm:$0xff]  ;;  %v1623_v4 = vld [vmem:[%s2885_s1 + $0x68] sm:$0xff] }
   0x2   :  { %v1609_v2 = vld [vmem:[%s2885_s1 + $0xf8] sm:$0xff]  ;;  %91 = vmatpush.msra.mxu0 %v1599_v0  ;;  %198 = vmatpush.msra.mxu2 %v1599_v0  ;;  %v1616_v3 = vld [vmem:[%s2885_s1 + $0xf0] sm:$0xff]  ;;  %v1630_v5 = vld [vmem:[%s2885_s1 + $0xe8] sm:$0xff] }
   0x3   :  { %132 = vmatpush.msra.mxu1 %v1609_v2  ;;  %239 = vmatpush.msra.mxu3 %v1609_v2  ;;  %v1637_v6 = vld [vmem:[%s2885_s1 + $0x60] sm:$0xff]  ;;  %v1651_v8 = vld [vmem:[%s2885_s1 + $0x58] sm:$0xff]  ;;  %v1665_v10 = vld [vmem:[%s2885_s1 + $0x50] sm:$0xff] }
   0x4   :  { %92 = vmatpush.msra.mxu0 %v1604_v1  ;;  %199 = vmatpush.msra.mxu2 %v1604_v1  ;;  %v1644_v7 = vld [vmem:[%s2885_s1 + $0xe0] sm:$0xff]  ;;  %v1658_v9 = vld [vmem:[%s2885_s1 + $0xd8] sm:$0xff]  ;;  %v1672_v11 = vld [vmem:[%s2885_s1 + $0xd0] sm:$0xff] }
   0x5   :  { %133 = vmatpush.msra.mxu1 %v1616_v3  ;;  %240 = vmatpush.msra.mxu3 %v1616_v3  ;;  %v1679_v12 = vld [vmem:[%s2885_s1 + $0x48] sm:$0xff]  ;;  %v1693_v14 = vld [vmem:[%s2885_s1 + $0x40] sm:$0xff]  ;;  %v1700_v15 = vld [vmem:[%s2885_s1 + $0x38] sm:$0xff] }
   0x6   :  { %93 = vmatpush.msra.mxu0 %v1623_v4  ;;  %200 = vmatpush.msra.mxu2 %v1623_v4  ;;  %v1686_v13 = vld [vmem:[%s2885_s1 + $0xc8] sm:$0xff]  ;;  %v1705_v16 = vld [vmem:[%s2885_s1 + $0xc0] sm:$0xff]  ;;  %v1714_v17 = vld [vmem:[%s2885_s1 + $0xb8] sm:$0xff] }
   0x7   :  { %134 = vmatpush.msra.mxu1 %v1630_v5  ;;  %241 = vmatpush.msra.mxu3 %v1630_v5 }
   0x8   :  { %94 = vmatpush.msra.mxu0 %v1637_v6  ;;  %201 = vmatpush.msra.mxu2 %v1637_v6 }
   0x9   :  { %135 = vmatpush.msra.mxu1 %v1644_v7  ;;  %242 = vmatpush.msra.mxu3 %v1644_v7 }
   0xa   :  { %95 = vmatpush.msra.mxu0 %v1651_v8  ;;  %202 = vmatpush.msra.mxu2 %v1651_v8 }
   0xb   :  { %136 = vmatpush.msra.mxu1 %v1658_v9  ;;  %243 = vmatpush.msra.mxu3 %v1658_v9 }
   0xc   :  { %96 = vmatpush.msra.mxu0 %v1665_v10  ;;  %203 = vmatpush.msra.mxu2 %v1665_v10 }
   0xd   :  { %137 = vmatpush.msra.mxu1 %v1672_v11  ;;  %244 = vmatpush.msra.mxu3 %v1672_v11 }
   0xe   :  { %97 = vmatpush.msra.mxu0 %v1679_v12  ;;  %204 = vmatpush.msra.mxu2 %v1679_v12 }
   0xf   :  { %138 = vmatpush.msra.mxu1 %v1686_v13  ;;  %245 = vmatpush.msra.mxu3 %v1686_v13 }
  0x10   :  { %98 = vmatpush.msra.mxu0 %v1693_v14  ;;  %205 = vmatpush.msra.mxu2 %v1693_v14 }
  0x11   :  { %16 = vsyncpa [#allocation3], 0  ;;  %139 = vmatpush.msra.mxu1 %v1705_v16  ;;  %246 = vmatpush.msra.mxu3 %v1705_v16  ;;  %v1721_v18 = vld [vmem:[%s2885_s1 + $0x30] sm:$0xff]  ;;  %v1735_v20 = vld [vmem:[%s2885_s1 + $0x28] sm:$0xff]  ;;  %s1534_s14 = smov 96   ;;  %vm598_vm0 = vcmask 261120  }
  0x12   :  { %99 = vmatpush.msra.mxu0 %v1700_v15  ;;  %206 = vmatpush.msra.mxu2 %v1700_v15  ;;  %v1728_v19 = vld [vmem:[%s2885_s1 + $0xb0] sm:$0xff]  ;;  %v1742_v21 = vld [vmem:[%s2885_s1 + $0xa8] sm:$0xff]  ;;  %v1749_v22 = vld [vmem:[%s2885_s1 + $0x20] sm:$0xff]  ;;  %vm607_vm1 = vcmask 523264   ;;  %vm616_vm2 = vcmask 785408   ;;  %vm629_vm3 = vcmask 1046528  }
  0x13   :  { %140 = vmatpush.msra.mxu1 %v1714_v17  ;;  %247 = vmatpush.msra.mxu3 %v1714_v17  ;;  %v1756_v23 = vld [vmem:[%s2885_s1 + $0xa0] sm:$0xff]  ;;  %v1763_v24 = vld [vmem:[%s2885_s1 + $0x18] sm:$0xff]  ;;  %v1777_v26 = vld [vmem:[%s2885_s1 + $0x10] sm:$0xff]  ;;  %vm640_vm4 = vcmask 1042432   ;;  %vm651_vm5 = vcmask 1041408   ;;  %vm933_vm6 = vcmask 1040384  }
  0x14   :  { %100 = vmatpush.msra.mxu0 %v1721_v18  ;;  %207 = vmatpush.msra.mxu2 %v1721_v18  ;;  %v1770_v25 = vld [vmem:[%s2885_s1 + $0x98] sm:$0xff]  ;;  %v1784_v27 = vld [vmem:[%s2885_s1 + $0x90] sm:$0xff]  ;;  %v1791_v28 = vld [vmem:[%s2885_s1 + $0x8] sm:$0xff]  ;;  %vm951_vm7 = vcmask 1043456   ;;  %vm918_vm8 = vcmask 1045504   ;;  %vm944_vm9 = vcmask 1044480  }
  0x15   :  { %141 = vmatpush.msra.mxu1 %v1728_v19  ;;  %248 = vmatpush.msra.mxu3 %v1728_v19  ;;  %v1798_v29 = vld [vmem:[%s2885_s1 + $0x88] sm:$0xff]  ;;  %v1805_v30 = vld [vmem:[%s2885_s1] sm:$0xff]  ;;  %v41_v36 = vld [vmem:[%s2884_s0 + $0x10] sm:$0xff]  ;;  %s1535_s24 = smov [#allocation2]  }
  0x16   :  { %101 = vmatpush.msra.mxu0 %v1735_v20  ;;  %208 = vmatpush.msra.mxu2 %v1735_v20  ;;  %v39_v31 = vld [vmem:[%s2884_s0] sm:$0xff]  ;;  %v40_v34 = vld [vmem:[%s2884_s0 + $0x8] sm:$0xff]  ;;  %v1372_v37 = vld [vmem:[%s2884_s0 + $0x90] sm:$0xff] }
  0x17   :  { %142 = vmatpush.msra.mxu1 %v1742_v21  ;;  %249 = vmatpush.msra.mxu3 %v1742_v21  ;;  %v1370_v32 = vld [vmem:[%s2884_s0 + $0x80] sm:$0xff]  ;;  %v1371_v35 = vld [vmem:[%s2884_s0 + $0x88] sm:$0xff]  ;;  %v42_v38 = vld [vmem:[%s2884_s0 + $0x18] sm:$0xff] }
  0x18   :  { %102 = vmatpush.msra.mxu0 %v1749_v22  ;;  %209 = vmatpush.msra.mxu2 %v1749_v22  ;;  %v1820_v33 = vld [vmem:[%s2885_s1 + $0x80] sm:$0xff]  ;;  %v1373_v39 = vld [vmem:[%s2884_s0 + $0x98] sm:$0xff]  ;;  %v44_v42 = vld [vmem:[%s2884_s0 + $0x28] sm:$0xff] }
  0x19   :  { %143 = vmatpush.msra.mxu1 %v1756_v23  ;;  %250 = vmatpush.msra.mxu3 %v1756_v23  ;;  %v43_v40 = vld [vmem:[%s2884_s0 + $0x20] sm:$0xff]  ;;  %v1375_v43 = vld [vmem:[%s2884_s0 + $0xa8] sm:$0xff]  ;;  %v45_v44 = vld [vmem:[%s2884_s0 + $0x30] sm:$0xff] }
  0x1a   :  { %103 = vmatpush.msra.mxu0 %v1763_v24  ;;  %210 = vmatpush.msra.mxu2 %v1763_v24  ;;  %v1374_v41 = vld [vmem:[%s2884_s0 + $0xa0] sm:$0xff]  ;;  %v1376_v45 = vld [vmem:[%s2884_s0 + $0xb0] sm:$0xff]  ;;  %v46_v46 = vld [vmem:[%s2884_s0 + $0x38] sm:$0xff] }
  0x1b   :  { %144 = vmatpush.msra.mxu1 %v1770_v25  ;;  %251 = vmatpush.msra.mxu3 %v1770_v25  ;;  %v1377_v47 = vld [vmem:[%s2884_s0 + $0xb8] sm:$0xff]  ;;  %v47_v48 = vld [vmem:[%s2884_s0 + $0x40] sm:$0xff]  ;;  %v48_v50 = vld [vmem:[%s2884_s0 + $0x48] sm:$0xff] }
  0x1c   :  { %104 = vmatpush.msra.mxu0 %v1777_v26  ;;  %211 = vmatpush.msra.mxu2 %v1777_v26  ;;  %v1378_v49 = vld [vmem:[%s2884_s0 + $0xc0] sm:$0xff]  ;;  %v1379_v51 = vld [vmem:[%s2884_s0 + $0xc8] sm:$0xff]  ;;  %v49_v52 = vld [vmem:[%s2884_s0 + $0x50] sm:$0xff] }
  0x1d   :  { %145 = vmatpush.msra.mxu1 %v1784_v27  ;;  %252 = vmatpush.msra.mxu3 %v1784_v27  ;;  %v1380_v53 = vld [vmem:[%s2884_s0 + $0xd0] sm:$0xff]  ;;  %v50_v54 = vld [vmem:[%s2884_s0 + $0x58] sm:$0xff]  ;;  %v51_v56 = vld [vmem:[%s2884_s0 + $0x60] sm:$0xff] }
  0x1e   :  { %105 = vmatpush.msra.mxu0 %v1791_v28  ;;  %212 = vmatpush.msra.mxu2 %v1791_v28  ;;  %v1381_v55 = vld [vmem:[%s2884_s0 + $0xd8] sm:$0xff]  ;;  %v1382_v57 = vld [vmem:[%s2884_s0 + $0xe0] sm:$0xff]  ;;  %v52_v58 = vld [vmem:[%s2884_s0 + $0x68] sm:$0xff] }
  0x1f   :  { %146 = vmatpush.msra.mxu1 %v1798_v29  ;;  %253 = vmatpush.msra.mxu3 %v1798_v29  ;;  %v1383_v59 = vld [vmem:[%s2884_s0 + $0xe8] sm:$0xff]  ;;  %v53_v60 = vld [vmem:[%s2884_s0 + $0x70] sm:$0xff]  ;;  %v54_v62 = vld [vmem:[%s2884_s0 + $0x78] sm:$0xff] }
  0x20   :  { %106 = vmatpush.msra.mxu0 %v1805_v30  ;;  %213 = vmatpush.msra.mxu2 %v1805_v30  ;;  %v1384_v61 = vld [vmem:[%s2884_s0 + $0xf0] sm:$0xff]  ;;  %v1385_v63 = vld [vmem:[%s2884_s0 + $0xf8] sm:$0xff] }
  0x21   :  { %107 = vmatmul.f32.vlgmr.msra.gmra.mxu0 %v39_v31  ;;  %214 = vmatmul.f32.vlgmr.msra.gmra.mxu2 %v1370_v32  ;;  %v1417_v31 = vld [vmem:[%s2884_s0 + $0x1f8] sm:$0xff] }
  0x22   :  { %305 = vmatpush.msrb.mxu0 %v1599_v0  ;;  %147 = vmatpush.msra.mxu1 %v1820_v33 }
  0x23   :  { %254 = vmatpush.msra.mxu3 %v1820_v33  ;;  %412 = vmatpush.msrb.mxu2 %v1599_v0  ;;  %v1386_v0 = vld [vmem:[%s2884_s0 + $0x100] sm:$0xff] }
  0x24   :  { %148 = vmatmul.f32.vlgmr.msra.gmra.mxu1 %v40_v34  ;;  %255 = vmatmul.f32.vlgmr.msra.gmra.mxu3 %v1371_v35 }
  0x25   :  { %346 = vmatpush.msrb.mxu1 %v1609_v2  ;;  %453 = vmatpush.msrb.mxu3 %v1609_v2  ;;  %v1387_v2 = vld [vmem:[%s2884_s0 + $0x108] sm:$0xff] }
  0x26   :  { %306 = vmatpush.msrb.mxu0 %v1604_v1  ;;  %413 = vmatpush.msrb.mxu2 %v1604_v1  ;;  %v1402_v1 = vld [vmem:[%s2884_s0 + $0x180] sm:$0xff] }
  0x27   :  { %347 = vmatpush.msrb.mxu1 %v1616_v3  ;;  %454 = vmatpush.msrb.mxu3 %v1616_v3  ;;  %v1403_v3 = vld [vmem:[%s2884_s0 + $0x188] sm:$0xff] }
  0x28   :  { %307 = vmatpush.msrb.mxu0 %v1623_v4  ;;  %414 = vmatpush.msrb.mxu2 %v1623_v4  ;;  %v1388_v4 = vld [vmem:[%s2884_s0 + $0x110] sm:$0xff] }
  0x29   :  { %110 = vmatmul.f32.gmra.mxu0 %v41_v36  ;;  %217 = vmatmul.f32.gmra.mxu2 %v1372_v37  ;;  %v2085_v37 = vld [vmem:[%s2886_s2] ss:$0 sm:$0xff]  ;;  %s1533_s2 = smov 64  }
  0x2a   :  { %348 = vmatpush.msrb.mxu1 %v1630_v5  ;;  %455 = vmatpush.msrb.mxu3 %v1630_v5  ;;  %v1404_v5 = vld [vmem:[%s2884_s0 + $0x190] sm:$0xff] }
  0x2b   :  { %308 = vmatpush.msrb.mxu0 %v1637_v6  ;;  %415 = vmatpush.msrb.mxu2 %v1637_v6  ;;  %v1389_v6 = vld [vmem:[%s2884_s0 + $0x118] sm:$0xff] }
  0x2c   :  { %151 = vmatmul.f32.gmra.mxu1 %v42_v38  ;;  %258 = vmatmul.f32.gmra.mxu3 %v1373_v39 }
  0x2d   :  { %349 = vmatpush.msrb.mxu1 %v1644_v7  ;;  %456 = vmatpush.msrb.mxu3 %v1644_v7  ;;  %v1405_v7 = vld [vmem:[%s2884_s0 + $0x198] sm:$0xff] }
  0x2e   :  { %309 = vmatpush.msrb.mxu0 %v1651_v8  ;;  %416 = vmatpush.msrb.mxu2 %v1651_v8  ;;  %v1390_v8 = vld [vmem:[%s2884_s0 + $0x120] sm:$0xff] }
  0x2f   :  { %350 = vmatpush.msrb.mxu1 %v1658_v9  ;;  %457 = vmatpush.msrb.mxu3 %v1658_v9  ;;  %v1406_v9 = vld [vmem:[%s2884_s0 + $0x1a0] sm:$0xff] }
  0x30   :  { %310 = vmatpush.msrb.mxu0 %v1665_v10  ;;  %417 = vmatpush.msrb.mxu2 %v1665_v10  ;;  %v1391_v10 = vld [vmem:[%s2884_s0 + $0x128] sm:$0xff] }
  0x31   :  { %113 = vmatmul.f32.gmra.mxu0 %v43_v40  ;;  %220 = vmatmul.f32.gmra.mxu2 %v1374_v41 }
  0x32   :  { %351 = vmatpush.msrb.mxu1 %v1672_v11  ;;  %458 = vmatpush.msrb.mxu3 %v1672_v11  ;;  %v1407_v11 = vld [vmem:[%s2884_s0 + $0x1a8] sm:$0xff] }
  0x33   :  { %311 = vmatpush.msrb.mxu0 %v1679_v12  ;;  %418 = vmatpush.msrb.mxu2 %v1679_v12  ;;  %v1392_v12 = vld [vmem:[%s2884_s0 + $0x130] sm:$0xff] }
  0x34   :  { %154 = vmatmul.f32.gmra.mxu1 %v44_v42  ;;  %261 = vmatmul.f32.gmra.mxu3 %v1375_v43 }
  0x35   :  { %352 = vmatpush.msrb.mxu1 %v1686_v13  ;;  %459 = vmatpush.msrb.mxu3 %v1686_v13  ;;  %v1408_v13 = vld [vmem:[%s2884_s0 + $0x1b0] sm:$0xff] }
  0x36   :  { %312 = vmatpush.msrb.mxu0 %v1693_v14  ;;  %419 = vmatpush.msrb.mxu2 %v1693_v14  ;;  %v1393_v14 = vld [vmem:[%s2884_s0 + $0x138] sm:$0xff] }
  0x37   :  { %353 = vmatpush.msrb.mxu1 %v1705_v16  ;;  %460 = vmatpush.msrb.mxu3 %v1705_v16  ;;  %v1394_v16 = vld [vmem:[%s2884_s0 + $0x140] sm:$0xff] }
  0x38   :  { %313 = vmatpush.msrb.mxu0 %v1700_v15  ;;  %420 = vmatpush.msrb.mxu2 %v1700_v15  ;;  %v1409_v15 = vld [vmem:[%s2884_s0 + $0x1b8] sm:$0xff] }
  0x39   :  { %116 = vmatmul.f32.gmra.mxu0 %v45_v44  ;;  %223 = vmatmul.f32.gmra.mxu2 %v1376_v45 }
  0x3a   :  { %354 = vmatpush.msrb.mxu1 %v1714_v17  ;;  %461 = vmatpush.msrb.mxu3 %v1714_v17  ;;  %v1410_v17 = vld [vmem:[%s2884_s0 + $0x1c0] sm:$0xff] }
  0x3b   :  { %314 = vmatpush.msrb.mxu0 %v1721_v18  ;;  %421 = vmatpush.msrb.mxu2 %v1721_v18  ;;  %v1395_v18 = vld [vmem:[%s2884_s0 + $0x148] sm:$0xff] }
  0x3c   :  { %157 = vmatmul.f32.gmra.mxu1 %v46_v46  ;;  %264 = vmatmul.f32.gmra.mxu3 %v1377_v47 }
  0x3d   :  { %355 = vmatpush.msrb.mxu1 %v1728_v19  ;;  %462 = vmatpush.msrb.mxu3 %v1728_v19  ;;  %v1411_v19 = vld [vmem:[%s2884_s0 + $0x1c8] sm:$0xff] }
  0x3e   :  { %315 = vmatpush.msrb.mxu0 %v1735_v20  ;;  %422 = vmatpush.msrb.mxu2 %v1735_v20  ;;  %v1396_v20 = vld [vmem:[%s2884_s0 + $0x150] sm:$0xff] }
  0x3f   :  { %356 = vmatpush.msrb.mxu1 %v1742_v21  ;;  %463 = vmatpush.msrb.mxu3 %v1742_v21  ;;  %v1412_v21 = vld [vmem:[%s2884_s0 + $0x1d0] sm:$0xff] }
  0x40   :  { %316 = vmatpush.msrb.mxu0 %v1749_v22  ;;  %423 = vmatpush.msrb.mxu2 %v1749_v22  ;;  %v1397_v22 = vld [vmem:[%s2884_s0 + $0x158] sm:$0xff] }
  0x41   :  { %119 = vmatmul.f32.gmra.mxu0 %v47_v48  ;;  %226 = vmatmul.f32.gmra.mxu2 %v1378_v49 }
  0x42   :  { %357 = vmatpush.msrb.mxu1 %v1756_v23  ;;  %464 = vmatpush.msrb.mxu3 %v1756_v23  ;;  %v1413_v23 = vld [vmem:[%s2884_s0 + $0x1d8] sm:$0xff] }
  0x43   :  { %317 = vmatpush.msrb.mxu0 %v1763_v24  ;;  %424 = vmatpush.msrb.mxu2 %v1763_v24  ;;  %v1398_v24 = vld [vmem:[%s2884_s0 + $0x160] sm:$0xff] }
  0x44   :  { %160 = vmatmul.f32.gmra.mxu1 %v48_v50  ;;  %267 = vmatmul.f32.gmra.mxu3 %v1379_v51 }
  0x45   :  { %358 = vmatpush.msrb.mxu1 %v1770_v25  ;;  %465 = vmatpush.msrb.mxu3 %v1770_v25  ;;  %v1414_v25 = vld [vmem:[%s2884_s0 + $0x1e0] sm:$0xff] }
  0x46   :  { %318 = vmatpush.msrb.mxu0 %v1777_v26  ;;  %425 = vmatpush.msrb.mxu2 %v1777_v26  ;;  %v1399_v26 = vld [vmem:[%s2884_s0 + $0x168] sm:$0xff] }
  0x47   :  { %359 = vmatpush.msrb.mxu1 %v1784_v27  ;;  %466 = vmatpush.msrb.mxu3 %v1784_v27  ;;  %v1415_v27 = vld [vmem:[%s2884_s0 + $0x1e8] sm:$0xff] }
  0x48   :  { %319 = vmatpush.msrb.mxu0 %v1791_v28  ;;  %426 = vmatpush.msrb.mxu2 %v1791_v28  ;;  %v1400_v28 = vld [vmem:[%s2884_s0 + $0x170] sm:$0xff] }
  0x49   :  { %122 = vmatmul.f32.gmra.mxu0 %v49_v52  ;;  %229 = vmatmul.f32.gmra.mxu2 %v1380_v53 }
  0x4a   :  { %360 = vmatpush.msrb.mxu1 %v1798_v29  ;;  %467 = vmatpush.msrb.mxu3 %v1798_v29  ;;  %v1416_v29 = vld [vmem:[%s2884_s0 + $0x1f0] sm:$0xff] }
  0x4b   :  { %320 = vmatpush.msrb.mxu0 %v1805_v30  ;;  %427 = vmatpush.msrb.mxu2 %v1805_v30  ;;  %v1401_v30 = vld [vmem:[%s2884_s0 + $0x178] sm:$0xff]  ;;  %s1532_s0 = smov 32  }
  0x4c   :  { %163 = vmatmul.f32.gmra.mxu1 %v50_v54  ;;  %270 = vmatmul.f32.gmra.mxu3 %v1381_v55 }
  0x4d   :  { %361 = vmatpush.msrb.mxu1 %v1820_v33  ;;  %468 = vmatpush.msrb.mxu3 %v1820_v33 }
  0x51   :  { %125 = vmatmul.f32.gmra.mxu0 %v51_v56  ;;  %232 = vmatmul.f32.gmra.mxu2 %v1382_v57 }
  0x54   :  { %166 = vmatmul.f32.gmra.mxu1 %v52_v58  ;;  %273 = vmatmul.f32.gmra.mxu3 %v1383_v59 }
  0x59   :  { %128 = vmatmul.f32.gmra.mxu0 %v53_v60  ;;  %235 = vmatmul.f32.gmra.mxu2 %v1384_v61 }
  0x5c   :  { %169 = vmatmul.f32.gmra.mxu1 %v54_v62  ;;  %276 = vmatmul.f32.gmra.mxu3 %v1385_v63 }
  0x61   :  { %321 = vmatmul.f32.vlgmr.msrb.gmra.mxu0 %v1386_v0  ;;  %428 = vmatmul.f32.vlgmr.msrb.gmra.mxu2 %v1402_v1 }
  0x64   :  { %362 = vmatmul.f32.vlgmr.msrb.gmra.mxu1 %v1387_v2  ;;  %469 = vmatmul.f32.vlgmr.msrb.gmra.mxu3 %v1403_v3 }
  0x69   :  { %324 = vmatmul.f32.gmra.mxu0 %v1388_v4  ;;  %431 = vmatmul.f32.gmra.mxu2 %v1404_v5 }
  0x6c   :  { %365 = vmatmul.f32.gmra.mxu1 %v1389_v6  ;;  %472 = vmatmul.f32.gmra.mxu3 %v1405_v7 }
  0x71   :  { %327 = vmatmul.f32.gmra.mxu0 %v1390_v8  ;;  %434 = vmatmul.f32.gmra.mxu2 %v1406_v9 }
  0x74   :  { %368 = vmatmul.f32.gmra.mxu1 %v1391_v10  ;;  %475 = vmatmul.f32.gmra.mxu3 %v1407_v11 }
  0x79   :  { %330 = vmatmul.f32.gmra.mxu0 %v1392_v12  ;;  %437 = vmatmul.f32.gmra.mxu2 %v1408_v13 }
  0x7c   :  { %371 = vmatmul.f32.gmra.mxu1 %v1393_v14  ;;  %478 = vmatmul.f32.gmra.mxu3 %v1409_v15 }
  0x81   :  { %333 = vmatmul.f32.gmra.mxu0 %v1394_v16  ;;  %440 = vmatmul.f32.gmra.mxu2 %v1410_v17 }
  0x84   :  { %374 = vmatmul.f32.gmra.mxu1 %v1395_v18  ;;  %481 = vmatmul.f32.gmra.mxu3 %v1411_v19 }
  0x89   :  { %336 = vmatmul.f32.gmra.mxu0 %v1396_v20  ;;  %443 = vmatmul.f32.gmra.mxu2 %v1412_v21 }
  0x8c   :  { %377 = vmatmul.f32.gmra.mxu1 %v1397_v22  ;;  %484 = vmatmul.f32.gmra.mxu3 %v1413_v23 }
  0x91   :  { %339 = vmatmul.f32.gmra.mxu0 %v1398_v24  ;;  %446 = vmatmul.f32.gmra.mxu2 %v1414_v25 }
  0x94   :  { %380 = vmatmul.f32.gmra.mxu1 %v1399_v26  ;;  %487 = vmatmul.f32.gmra.mxu3 %v1415_v27 }
  0x99   :  { %342 = vmatmul.f32.gmra.mxu0 %v1400_v28  ;;  %449 = vmatmul.f32.gmra.mxu2 %v1416_v29 }
  0x9c   :  { %383 = vmatmul.f32.gmra.mxu1 %v1401_v30  ;;  %490 = vmatmul.f32.gmra.mxu3 %v1417_v31 }
  0x9e   :  { %v2076_v32 = vpop.f32.mrf.mxu0 }
  0xa1   :  { %v2078_v33 = vpop.f32.mrf.mxu1 }
  0xa4   :  { %v215_v34 = vpop.f32.mrf.mxu2 }
  0xa5   :  { %v216_v39 = vadd.f32 %v2085_v37, %v215_v34 }
  0xa6   :  { %v2080_v35 = vpop.f32.mrf.mxu0 }
  0xa7   :  { %v256_v36 = vpop.f32.mrf.mxu3 }
  0xa8   :  { %v257_v42 = vadd.f32 %v256_v36, %v216_v39 }
  0xa9   :  { %v2087_v38 = vpop.f32.mrf.mxu1 }
  0xaa   :  { %v280_v48 = vmax.f32 %v257_v42, 0.0 }
  0xac   :  { %v218_v40 = vpop.f32.mrf.mxu2 }
  0xad   :  { %v219_v41 = vadd.f32 %v2085_v37, %v218_v40 }
  0xae   :  { %v114_v43 = vpop.f32.mrf.mxu0 }
  0xaf   :  { %v115_v44 = vadd.f32 %v2085_v37, %v114_v43  ;;  %v259_v45 = vpop.f32.mrf.mxu3 }
  0xb0   :  { %v260_v46 = vadd.f32 %v259_v45, %v219_v41 }
  0xb1   :  { %v155_v47 = vpop.f32.mrf.mxu1 }
  0xb2   :  { %v281_v49 = vmax.f32 %v260_v46, 0.0  ;;  %v2092_v50 = vadd.f32 %v155_v47, %v115_v44 }
  0xb4   :  { %v221_v51 = vpop.f32.mrf.mxu2  ;;  %v1424_v52 = vpack.i.bf16 %v281_v49, %v280_v48 }
  0xb5   :  { %v222_v53 = vadd.f32 %v2085_v37, %v221_v51 }
  0xb6   :  { %1425 = vrot.lane.b32.xlu0 %v1424_v52, %s1532_s0  ;;  %v117_v54 = vpop.f32.mrf.mxu0 }
  0xb7   :  { %v118_v55 = vadd.f32 %v2085_v37, %v117_v54  ;;  %v262_v56 = vpop.f32.mrf.mxu3 }
  0xb8   :  { %v2097_v57 = vadd.f32 %v262_v56, %v222_v53 }
  0xb9   :  { %v158_v58 = vpop.f32.mrf.mxu1 }
  0xba   :  { %v2099_v59 = vadd.f32 %v158_v58, %v118_v55 }
  0xbc   :  { %v224_v60 = vpop.f32.mrf.mxu2 }
  0xbd   :  { %v225_v49 = vadd.f32 %v2085_v37, %v224_v60 }
  0xbe   :  { %v120_v61 = vpop.f32.mrf.mxu0 }
  0xbf   :  { %v121_v62 = vadd.f32 %v2085_v37, %v120_v61  ;;  %v265_v63 = vpop.f32.mrf.mxu3 }
  0xc0   :  { %v266_v58 = vadd.f32 %v265_v63, %v225_v49  ;;  %v759_v49 = vld [vmem:[%s2887_s3 + $0x1f8] sm:$0xff] }
  0xc1   :  { %v161_v0 = vpop.f32.mrf.mxu1  ;;  %869 = vmatpush.msra.mxu3 %v759_v49 }
  0xc2   :  { %v2102_v1 = vadd.f32 %v161_v0, %v121_v62 }
  0xc4   :  { %v227_v2 = vpop.f32.mrf.mxu2 }
  0xc5   :  { %v228_v39 = vadd.f32 %v2085_v37, %v227_v2 }
  0xc6   :  { %v123_v3 = vpop.f32.mrf.mxu0 }
  0xc7   :  { %v124_v4 = vadd.f32 %v2085_v37, %v123_v3  ;;  %v268_v5 = vpop.f32.mrf.mxu3 }
  0xc8   :  { %v269_v51 = vadd.f32 %v268_v5, %v228_v39 }
  0xc9   :  { %v164_v6 = vpop.f32.mrf.mxu1 }
  0xca   :  { %v2105_v7 = vadd.f32 %v164_v6, %v124_v4  ;;  %v284_v61 = vmax.f32 %v269_v51, 0.0 }
  0xcc   :  { %v230_v8 = vpop.f32.mrf.mxu2 }
  0xcd   :  { %v231_v31 = vadd.f32 %v2085_v37, %v230_v8  ;;  %v283_v8 = vmax.f32 %v266_v58, 0.0  ;;  %v710_v58 = vld [vmem:[%s2887_s3 + $0x70] sm:$0xff] }
  0xce   :  { %v126_v9 = vpop.f32.mrf.mxu0 }
  0xcf   :  { %v127_v10 = vadd.f32 %v2085_v37, %v126_v9  ;;  %v271_v11 = vpop.f32.mrf.mxu3 }
  0xd0   :  { %v272_v44 = vadd.f32 %v271_v11, %v231_v31  ;;  %v282_v11 = vmax.f32 %v2097_v57, 0.0 }
  0xd1   :  { %v167_v12 = vpop.f32.mrf.mxu1 }
  0xd2   :  { %v2108_v13 = vadd.f32 %v167_v12, %v127_v10  ;;  %v285_v54 = vmax.f32 %v272_v44, 0.0 }
  0xd4   :  { %v233_v14 = vpop.f32.mrf.mxu2  ;;  %v1454_v3 = vpack.i.bf16 %v285_v54, %v284_v61 }
  0xd5   :  { %v234_v4 = vadd.f32 %v2085_v37, %v233_v14 }
  0xd6   :  { %v129_v15 = vpop.f32.mrf.mxu0 }
  0xd7   :  { %v130_v16 = vadd.f32 %v2085_v37, %v129_v15  ;;  %v274_v17 = vpop.f32.mrf.mxu3 }
  0xd8   :  { %v275_v12 = vadd.f32 %v274_v17, %v234_v4 }
  0xd9   :  { %v170_v18 = vpop.f32.mrf.mxu1 }
  0xda   :  { %v2111_v19 = vadd.f32 %v170_v18, %v130_v16  ;;  %v1439_v16 = vpack.i.bf16 %v283_v8, %v282_v11 }
  0xdc   :  { %v236_v20 = vpop.f32.mrf.mxu2 }
  0xde   :  { %v322_v21 = vpop.f32.mrf.mxu0 }
  0xdf   :  { %v2113_v22 = vpop.f32.mrf.mxu3  ;;  %v323_v24 = vadd.f32 %v2085_v37, %v322_v21 }
  0xe1   :  { %v363_v23 = vpop.f32.mrf.mxu1 }
  0xe2   :  { %v364_v29 = vadd.f32 %v363_v23, %v323_v24 }
  0xe4   :  { %v429_v25 = vpop.f32.mrf.mxu2  ;;  %v387_v40 = vmax.f32 %v364_v29, 0.0 }
  0xe5   :  { %v430_v34 = vadd.f32 %v2085_v37, %v429_v25  ;;  %v286_v25 = vmax.f32 %v275_v12, 0.0  ;;  %v708_v12 = vld [vmem:[%s2887_s3 + $0x60] sm:$0xff] }
  0xe6   :  { %v325_v26 = vpop.f32.mrf.mxu0 }
  0xe7   :  { %v326_v27 = vadd.f32 %v2085_v37, %v325_v26  ;;  %v470_v28 = vpop.f32.mrf.mxu3  ;;  %v237_v26 = vadd.f32 %v2085_v37, %v236_v20 }
  0xe8   :  { %v471_v45 = vadd.f32 %v470_v28, %v430_v34 }
  0xe9   :  { %v366_v30 = vpop.f32.mrf.mxu1  ;;  %v278_v31 = vadd.f32 %v2113_v22, %v237_v26  ;;  %v743_v22 = vld [vmem:[%s2887_s3 + $0x178] sm:$0xff] }
  0xea   :  { %v367_v36 = vadd.f32 %v366_v30, %v326_v27  ;;  %v494_v55 = vmax.f32 %v471_v45, 0.0  ;;  %834 = vmatpush.msra.mxu2 %v743_v22  ;;  %v723_v26 = vld [vmem:[%s2887_s3 + $0xd8] sm:$0xff]  ;;  %v752_v22 = vld [vmem:[%s2887_s3 + $0x1c0] sm:$0xff] }
  0xeb   :  { %v287_v20 = vmax.f32 %v278_v31, 0.0  ;;  %v754_v31 = vld [vmem:[%s2887_s3 + $0x1d0] sm:$0xff] }
  0xec   :  { %v388_v41 = vmax.f32 %v367_v36, 0.0  ;;  %v432_v42 = vpop.f32.mrf.mxu2 }
  0xed   :  { %v433_v43 = vadd.f32 %v2085_v37, %v432_v42 }
  0xee   :  { %v1429_v46 = vpack.i.bf16 %v388_v41, %v387_v40  ;;  %v328_v47 = vpop.f32.mrf.mxu0 }
  0xef   :  { %v473_v48 = vpop.f32.mrf.mxu3  ;;  %v329_v62 = vadd.f32 %v2085_v37, %v328_v47 }
  0xf0   :  { %v474_v52 = vadd.f32 %v473_v48, %v433_v43  ;;  %1430 = vrot.lane.b32.xlu0 %v1429_v46, %s1533_s2  ;;  %v711_v48 = vld [vmem:[%s2887_s3 + $0x78] sm:$0xff] }
  0xf1   :  { %v369_v53 = vpop.f32.mrf.mxu1  ;;  %764 = vmatpush.msra.mxu0 %v711_v48 }
  0xf2   :  { %v495_v56 = vmax.f32 %v474_v52, 0.0  ;;  %v370_v9 = vadd.f32 %v369_v53, %v329_v62  ;;  %v758_v62 = vld [vmem:[%s2887_s3 + $0x1f0] sm:$0xff] }
  0xf3   :  { %765 = vmatpush.msra.mxu0 %v710_v58  ;;  %870 = vmatpush.msra.mxu3 %v758_v62  ;;  %v719_v58 = vld [vmem:[%s2887_s3 + $0xb8] sm:$0xff]  ;;  %v734_v62 = vld [vmem:[%s2887_s3 + $0x130] sm:$0xff] }
  0xf4   :  { %v1434_v0 = vpack.i.bf16 %v495_v56, %v494_v55  ;;  %v435_v2 = vpop.f32.mrf.mxu2  ;;  %v389_v14 = vmax.f32 %v370_v9, 0.0  ;;  %v727_v55 = vld [vmem:[%s2887_s3 + $0xf8] sm:$0xff]  ;;  %v742_v56 = vld [vmem:[%s2887_s3 + $0x170] sm:$0xff]  ;;  %v725_v9 = vld [vmem:[%s2887_s3 + $0xe8] sm:$0xff] }
  0xf5   :  { %v436_v63 = vadd.f32 %v2085_v37, %v435_v2  ;;  %799 = vmatpush.msra.mxu1 %v727_v55  ;;  %v741_v2 = vld [vmem:[%s2887_s3 + $0x168] sm:$0xff]  ;;  %835 = vmatpush.msra.mxu2 %v742_v56  ;;  %v751_v56 = vld [vmem:[%s2887_s3 + $0x1b8] sm:$0xff] }
  0xf6   :  { %1435 = vrot.lane.b32.xlu1 %v1434_v0, %s1534_s14  ;;  %v331_v60 = vpop.f32.mrf.mxu0  ;;  %v726_v0 = vld [vmem:[%s2887_s3 + $0xf0] sm:$0xff] }
  0xf7   :  { %v332_v5 = vadd.f32 %v2085_v37, %v331_v60  ;;  %v476_v6 = vpop.f32.mrf.mxu3  ;;  %v709_v60 = vld [vmem:[%s2887_s3 + $0x68] sm:$0xff]  ;;  %800 = vmatpush.msra.mxu1 %v726_v0  ;;  %836 = vmatpush.msra.mxu2 %v741_v2  ;;  %v702_v0 = vld [vmem:[%s2887_s3 + $0x30] sm:$0xff] }
  0xf8   :  { %1455 = vrot.lane.b32.xlu0 %v1454_v3, %s1532_s0  ;;  %v477_v21 = vadd.f32 %v476_v6, %v436_v63  ;;  %v740_v63 = vld [vmem:[%s2887_s3 + $0x160] sm:$0xff]  ;;  %766 = vmatpush.msra.mxu0 %v709_v60  ;;  %v750_v2 = vld [vmem:[%s2887_s3 + $0x1b0] sm:$0xff]  ;;  %v733_v60 = vld [vmem:[%s2887_s3 + $0x128] sm:$0xff] }
  0xf9   :  { %v372_v10 = vpop.f32.mrf.mxu1  ;;  %801 = vmatpush.msra.mxu1 %v725_v9  ;;  %837 = vmatpush.msra.mxu2 %v740_v63  ;;  %v749_v9 = vld [vmem:[%s2887_s3 + $0x1a8] sm:$0xff] }
  0xfa   :  { %v373_v15 = vadd.f32 %v372_v10, %v332_v5  ;;  %v496_v57 = vmax.f32 %v477_v21, 0.0  ;;  %v757_v5 = vld [vmem:[%s2887_s3 + $0x1e8] sm:$0xff]  ;;  %767 = vmatpush.msra.mxu0 %v708_v12  ;;  %v748_v12 = vld [vmem:[%s2887_s3 + $0x1a0] sm:$0xff] }
  0xfb   :  { %871 = vmatpush.msra.mxu3 %v757_v5  ;;  %v717_v63 = vld [vmem:[%s2887_s3 + $0xa8] sm:$0xff] }
  0xfc   :  { %v390_v18 = vmax.f32 %v373_v15, 0.0  ;;  %v438_v23 = vpop.f32.mrf.mxu2  ;;  %v756_v15 = vld [vmem:[%s2887_s3 + $0x1e0] sm:$0xff] }
  0xfd   :  { %v439_v24 = vadd.f32 %v2085_v37, %v438_v23  ;;  %872 = vmatpush.msra.mxu3 %v756_v15  ;;  %v716_v15 = vld [vmem:[%s2887_s3 + $0xa0] sm:$0xff] }
  0xfe   :  { %1440 = vrot.lane.b32.xlu1 %v1439_v16, %s1532_s0  ;;  %v334_v27 = vpop.f32.mrf.mxu0  ;;  %v1444_v28 = vpack.i.bf16 %v390_v18, %v389_v14  ;;  %v724_v14 = vld [vmem:[%s2887_s3 + $0xe0] sm:$0xff]  ;;  %v739_v18 = vld [vmem:[%s2887_s3 + $0x158] sm:$0xff] }
  0xff   :  { %v479_v29 = vpop.f32.mrf.mxu3  ;;  %v335_v36 = vadd.f32 %v2085_v37, %v334_v27  ;;  %802 = vmatpush.msra.mxu1 %v724_v14  ;;  %838 = vmatpush.msra.mxu2 %v739_v18  ;;  %v699_v14 = vld [vmem:[%s2887_s3 + $0x18] sm:$0xff] }
 0x100   :  { %1445 = vrot.lane.b32.xlu2 %v1444_v28, %s1533_s2  ;;  %522 = vrot.lane.b32.xlu0 %v286_v25, %s1532_s0  ;;  %v480_v17 = vadd.f32 %v479_v29, %v439_v24  ;;  %v707_v24 = vld [vmem:[%s2887_s3 + $0x58] sm:$0xff] }
 0x101   :  { %v375_v30 = vpop.f32.mrf.mxu1  ;;  %v755_v25 = vld [vmem:[%s2887_s3 + $0x1d8] sm:$0xff]  ;;  %768 = vmatpush.msra.mxu0 %v707_v24  ;;  %803 = vmatpush.msra.mxu1 %v723_v26  ;;  %v698_v24 = vld [vmem:[%s2887_s3 + $0x10] sm:$0xff]  ;;  %v697_v26 = vld [vmem:[%s2887_s3 + $0x8] sm:$0xff] }
 0x102   :  { %v497_v34 = vmax.f32 %v480_v17, 0.0  ;;  %v376_v44 = vadd.f32 %v375_v30, %v335_v36  ;;  %v706_v17 = vld [vmem:[%s2887_s3 + $0x50] sm:$0xff]  ;;  %873 = vmatpush.msra.mxu3 %v755_v25  ;;  %v747_v18 = vld [vmem:[%s2887_s3 + $0x198] sm:$0xff] }
 0x103   :  { %v722_v36 = vld [vmem:[%s2887_s3 + $0xd0] sm:$0xff]  ;;  %769 = vmatpush.msra.mxu0 %v706_v17  ;;  %v745_v17 = vld [vmem:[%s2887_s3 + $0x188] sm:$0xff] }
 0x104   :  { %v1449_v39 = vpack.i.bf16 %v497_v34, %v496_v57  ;;  %v441_v40 = vpop.f32.mrf.mxu2  ;;  %v391_v51 = vmax.f32 %v376_v44, 0.0  ;;  %v738_v57 = vld [vmem:[%s2887_s3 + $0x150] sm:$0xff]  ;;  %874 = vmatpush.msra.mxu3 %v754_v31  ;;  %v721_v44 = vld [vmem:[%s2887_s3 + $0xc8] sm:$0xff]  ;;  %804 = vmatpush.msra.mxu1 %v722_v36  ;;  %v728_v31 = vld [vmem:[%s2887_s3 + $0x100] sm:$0xff] }
 0x105   :  { %v442_v45 = vadd.f32 %v2085_v37, %v441_v40  ;;  %839 = vmatpush.msra.mxu2 %v738_v57  ;;  %v746_v25 = vld [vmem:[%s2887_s3 + $0x190] sm:$0xff]  ;;  %v713_v57 = vld [vmem:[%s2887_s3 + $0x88] sm:$0xff] }
 0x106   :  { %v337_v41 = vpop.f32.mrf.mxu0  ;;  %805 = vmatpush.msra.mxu1 %v721_v44 }
 0x107   :  { %v338_v42 = vadd.f32 %v2085_v37, %v337_v41  ;;  %v482_v43 = vpop.f32.mrf.mxu3  ;;  %v705_v41 = vld [vmem:[%s2887_s3 + $0x48] sm:$0xff] }
 0x108   :  { %524 = vrot.lane.b32.xlu0 %v287_v20, %s1532_s0  ;;  %1450 = vrot.lane.b32.xlu2 %v1449_v39, %s1534_s14  ;;  %v483_v53 = vadd.f32 %v482_v43, %v442_v45  ;;  %v737_v39 = vld [vmem:[%s2887_s3 + $0x148] sm:$0xff]  ;;  %v736_v45 = vld [vmem:[%s2887_s3 + $0x140] sm:$0xff] }
 0x109   :  { %v378_v46 = vpop.f32.mrf.mxu1  ;;  %840 = vmatpush.msra.mxu2 %v737_v39  ;;  %770 = vmatpush.msra.mxu0 %v705_v41  ;;  %v109_v39 = vadd.f32 %v2085_v37, %v2076_v32 }
 0x10a   :  { %v379_v47 = vadd.f32 %v378_v46, %v338_v42  ;;  %v498_v10 = vmax.f32 %v483_v53, 0.0  ;;  %v753_v42 = vld [vmem:[%s2887_s3 + $0x1c8] sm:$0xff]  ;;  %v703_v53 = vld [vmem:[%s2887_s3 + $0x38] sm:$0xff] }
 0x10b   :  { %875 = vmatpush.msra.mxu3 %v753_v42  ;;  %841 = vmatpush.msra.mxu2 %v736_v45 }
 0x10c   :  { %v392_v52 = vmax.f32 %v379_v47, 0.0  ;;  %v444_v54 = vpop.f32.mrf.mxu2  ;;  %v704_v47 = vld [vmem:[%s2887_s3 + $0x40] sm:$0xff] }
 0x10d   :  { %v445_v61 = vadd.f32 %v2085_v37, %v444_v54  ;;  %771 = vmatpush.msra.mxu0 %v704_v47  ;;  %876 = vmatpush.msra.mxu3 %v752_v22 }
 0x10e   :  { %v1459_v3 = vpack.i.bf16 %v392_v52, %v391_v51  ;;  %v340_v4 = vpop.f32.mrf.mxu0  ;;  %v720_v51 = vld [vmem:[%s2887_s3 + $0xc0] sm:$0xff]  ;;  %v735_v52 = vld [vmem:[%s2887_s3 + $0x138] sm:$0xff] }
 0x10f   :  { %v341_v6 = vadd.f32 %v2085_v37, %v340_v4  ;;  %v485_v8 = vpop.f32.mrf.mxu3  ;;  %806 = vmatpush.msra.mxu1 %v720_v51  ;;  %842 = vmatpush.msra.mxu2 %v735_v52  ;;  %v718_v4 = vld [vmem:[%s2887_s3 + $0xb0] sm:$0xff] }
 0x110   :  { %1460 = vrot.lane.b32.xlu1 %v1459_v3, %s1533_s2  ;;  %v486_v11 = vadd.f32 %v485_v8, %v445_v61  ;;  %772 = vmatpush.msra.mxu0 %v703_v53  ;;  %v701_v8 = vld [vmem:[%s2887_s3 + $0x28] sm:$0xff] }
 0x111   :  { %v381_v16 = vpop.f32.mrf.mxu1  ;;  %877 = vmatpush.msra.mxu3 %v751_v56  ;;  %807 = vmatpush.msra.mxu1 %v719_v58 }
 0x112   :  { %v382_v21 = vadd.f32 %v381_v16, %v341_v6  ;;  %v499_v23 = vmax.f32 %v486_v11, 0.0  ;;  %843 = vmatpush.msra.mxu2 %v734_v62  ;;  %773 = vmatpush.msra.mxu0 %v702_v0  ;;  %v700_v11 = vld [vmem:[%s2887_s3 + $0x20] sm:$0xff]  ;;  %v731_v16 = vld [vmem:[%s2887_s3 + $0x118] sm:$0xff] }
 0x113   :  { %878 = vmatpush.msra.mxu3 %v750_v2  ;;  %808 = vmatpush.msra.mxu1 %v718_v4 }
 0x114   :  { %v393_v27 = vmax.f32 %v382_v21, 0.0  ;;  %v1464_v28 = vpack.i.bf16 %v499_v23, %v498_v10  ;;  %v447_v29 = vpop.f32.mrf.mxu2  ;;  %844 = vmatpush.msra.mxu2 %v733_v60  ;;  %774 = vmatpush.msra.mxu0 %v701_v8  ;;  %v732_v10 = vld [vmem:[%s2887_s3 + $0x120] sm:$0xff]  ;;  %v715_v21 = vld [vmem:[%s2887_s3 + $0x98] sm:$0xff]  ;;  %v730_v23 = vld [vmem:[%s2887_s3 + $0x110] sm:$0xff] }
 0x115   :  { %v448_v30 = vadd.f32 %v2085_v37, %v447_v29  ;;  %879 = vmatpush.msra.mxu3 %v749_v9  ;;  %809 = vmatpush.msra.mxu1 %v717_v63  ;;  %v729_v29 = vld [vmem:[%s2887_s3 + $0x108] sm:$0xff] }
 0x116   :  { %v343_v34 = vpop.f32.mrf.mxu0  ;;  %1465 = vrot.lane.b32.xlu2 %v1464_v28, %s1534_s14  ;;  %845 = vmatpush.msra.mxu2 %v732_v10  ;;  %v696_v28 = vld [vmem:[%s2887_s3] sm:$0xff] }
 0x117   :  { %v344_v40 = vadd.f32 %v2085_v37, %v343_v34  ;;  %v488_v20 = vpop.f32.mrf.mxu3  ;;  %775 = vmatpush.msra.mxu0 %v700_v11  ;;  %880 = vmatpush.msra.mxu3 %v748_v12  ;;  %v744_v34 = vld [vmem:[%s2887_s3 + $0x180] sm:$0xff] }
 0x118   :  { %554 = vrot.lane.b32.xlu1 %v393_v27, %s1533_s2  ;;  %v489_v43 = vadd.f32 %v488_v20, %v448_v30  ;;  %810 = vmatpush.msra.mxu1 %v716_v15  ;;  %v714_v27 = vld [vmem:[%s2887_s3 + $0x90] sm:$0xff]  ;;  %v712_v30 = vld [vmem:[%s2887_s3 + $0x80] sm:$0xff]  ;;  %v150_v20 = vadd.f32 %v2078_v33, %v109_v39 }
 0x119   :  { %v384_v46 = vpop.f32.mrf.mxu1  ;;  %846 = vmatpush.msra.mxu2 %v731_v16  ;;  %776 = vmatpush.msra.mxu0 %v699_v14 }
 0x11a   :  { %v385_v48 = vadd.f32 %v384_v46, %v344_v40  ;;  %v500_v49 = vmax.f32 %v489_v43, 0.0  ;;  %881 = vmatpush.msra.mxu3 %v747_v18  ;;  %811 = vmatpush.msra.mxu1 %v715_v21  ;;  %v112_v40 = vadd.f32 %v2085_v37, %v2080_v35  ;;  %v173_v47 = vmax.f32 %v150_v20, 0.0 }
 0x11b   :  { %847 = vmatpush.msra.mxu2 %v730_v23  ;;  %777 = vmatpush.msra.mxu0 %v698_v24  ;;  %v177_v20 = vmax.f32 %v2102_v1, 0.0 }
 0x11c   :  { %v394_v54 = vmax.f32 %v385_v48, 0.0  ;;  %v450_v55 = vpop.f32.mrf.mxu2  ;;  %882 = vmatpush.msra.mxu3 %v746_v25  ;;  %812 = vmatpush.msra.mxu1 %v714_v27  ;;  %v153_v41 = vadd.f32 %v2087_v38, %v112_v40 }
 0x11d   :  { %v451_v61 = vadd.f32 %v2085_v37, %v450_v55  ;;  %778 = vmatpush.msra.mxu0 %v697_v26  ;;  %848 = vmatpush.msra.mxu2 %v729_v29 }
 0x11e   :  { %586 = vrot.lane.b32.xlu2 %v500_v49, %s1534_s14  ;;  %813 = vmatpush.msra.mxu1 %v713_v57  ;;  %v174_v22 = vmax.f32 %v153_v41, 0.0  ;;  %v178_v41 = vmax.f32 %v2105_v7, 0.0 }
 0x11f   :  { %v491_v3 = vpop.f32.mrf.mxu3  ;;  %779 = vmatpush.msra.mxu0 %v696_v28  ;;  %883 = vmatpush.msra.mxu3 %v745_v17 }
 0x120   :  { %556 = vrot.lane.b32.xlu1 %v394_v54, %s1533_s2  ;;  %v492_v5 = vadd.f32 %v491_v3, %v451_v61  ;;  %814 = vmatpush.msra.mxu1 %v712_v30 }
 0x121   :  { %849 = vmatpush.msra.mxu2 %v728_v31  ;;  %884 = vmatpush.msra.mxu3 %v744_v34 }
 0x122   :  { %v501_v6 = vmax.f32 %v492_v5, 0.0  ;;  %v175_v5 = vmax.f32 %v2092_v50, 0.0 }
 0x126   :  { %588 = vrot.lane.b32.xlu2 %v501_v6, %s1534_s14  ;;  %v176_v6 = vmax.f32 %v2099_v59, 0.0 }
 0x128   :  { %v1426_v36 = vpop.permute.xlu0 %1425 }
 0x129   :  { %v1428_v43 = vunpack.i.h.bf16 %v1426_v36  ;;  %v1427_v44 = vunpack.i.l.bf16 %v1426_v36 }
 0x12b   :  { %v599_v32 = vsel %vm598_vm0, %v173_v47, %v1427_v44  ;;  %v600_v35 = vsel %vm598_vm0, %v174_v22, %v1428_v43 }
 0x15a   :  { %v1446_v48 = vpop.permute.xlu2 %1445 }
 0x15b   :  { %v1448_v63 = vunpack.i.h.bf16 %v1446_v48  ;;  %v1447_v10 = vunpack.i.l.bf16 %v1446_v48 }
 0x162   :  { %v1431_v42 = vpop.permute.xlu0 %1430  ;;  %v1451_v4 = vpop.permute.xlu2 %1450 }
 0x163   :  { %v1433_v45 = vunpack.i.h.bf16 %v1431_v42  ;;  %v1432_v46 = vunpack.i.l.bf16 %v1431_v42  ;;  %v1453_v11 = vunpack.i.h.bf16 %v1451_v4  ;;  %v1452_v12 = vunpack.i.l.bf16 %v1451_v4 }
 0x165   :  { %v609_v38 = vsel %vm607_vm1, %v600_v35, %v1433_v45  ;;  %v608_v51 = vsel %vm607_vm1, %v599_v32, %v1432_v46 }
 0x168   :  { %v1436_v49 = vpop.permute.xlu1 %1435 }
 0x169   :  { %v1438_v37 = vunpack.i.h.bf16 %v1436_v49  ;;  %v1437_v33 = vunpack.i.l.bf16 %v1436_v49 }
 0x16a   :  { %v1456_v34 = vpop.permute.xlu0 %1455 }
 0x16b   :  { %v618_v52 = vsel %vm616_vm2, %v609_v38, %v1438_v37  ;;  %v617_v53 = vsel %vm616_vm2, %v608_v51, %v1437_v33  ;;  %v1458_v39 = vunpack.i.h.bf16 %v1456_v34  ;;  %v1457_v40 = vunpack.i.l.bf16 %v1456_v34 }
 0x16c   :  { %v630_v54 = vrot.slane %v617_v53, 1  ;;  %v641_v55 = vrot.slane %v617_v53, 5  ;;  %v652_v56 = vrot.slane %v617_v53, 6  ;;  %780 = vmatmul.f32.vlgmr.msra.gmra.mxu0 %v617_v53  ;;  %v631_v58 = vrot.slane %v618_v52, 1 }
 0x16d   :  { %v642_v61 = vrot.slane %v618_v52, 5  ;;  %v653_v62 = vrot.slane %v618_v52, 6  ;;  %v603_v45 = vsel %vm598_vm0, %v177_v20, %v1457_v40  ;;  %v604_v46 = vsel %vm598_vm0, %v178_v41, %v1458_v39 }
 0x16e   :  { %v632_v0 = vsel %vm629_vm3, %v630_v54, %v631_v58 }
 0x16f   :  { %815 = vmatmul.f32.vlgmr.msra.gmra.mxu1 %v632_v0  ;;  %v643_v2 = vsel %vm640_vm4, %v641_v55, %v642_v61  ;;  %v654_v3 = vsel %vm651_vm5, %v652_v56, %v653_v62 }
 0x170   :  { %850 = vmatmul.f32.vlgmr.msra.gmra.mxu2 %v643_v2  ;;  %885 = vmatmul.f32.vlgmr.msra.gmra.mxu3 %v654_v3  ;;  %v1441_v60 = vpop.permute.xlu1 %1440  ;;  %v1466_v36 = vpop.permute.xlu2 %1465 }
 0x171   :  { %v1443_v8 = vunpack.i.h.bf16 %v1441_v60  ;;  %v1442_v9 = vunpack.i.l.bf16 %v1441_v60  ;;  %v1468_v47 = vunpack.i.h.bf16 %v1466_v36  ;;  %v1467_v22 = vunpack.i.l.bf16 %v1466_v36 }
 0x172   :  { %v523_v48 = vpop.permute.xlu0 %522 }
 0x173   :  { %v601_v15 = vsel %vm598_vm0, %v175_v5, %v1442_v9  ;;  %v602_v16 = vsel %vm598_vm0, %v176_v6, %v1443_v8  ;;  %v180_v9 = vmax.f32 %v2111_v19, 0.0 }
 0x174   :  { %v610_v14 = vsel %vm607_vm1, %v601_v15, %v1447_v10  ;;  %v611_v18 = vsel %vm607_vm1, %v602_v16, %v1448_v63  ;;  %783 = vmatmul.f32.gmra.mxu0 %v618_v52  ;;  %v179_v52 = vmax.f32 %v2108_v13, 0.0 }
 0x175   :  { %v619_v21 = vsel %vm616_vm2, %v610_v14, %v1452_v12  ;;  %v620_v50 = vsel %vm616_vm2, %v611_v18, %v1453_v11 }
 0x176   :  { %v633_v59 = vrot.slane %v619_v21, 1  ;;  %v644_v23 = vrot.slane %v619_v21, 5  ;;  %v655_v24 = vrot.slane %v619_v21, 6  ;;  %v635_v25 = vrot.slane %v620_v50, 1 }
 0x177   :  { %v646_v26 = vrot.slane %v620_v50, 5  ;;  %v657_v27 = vrot.slane %v620_v50, 6 }
 0x178   :  { %v634_v28 = vsel %vm629_vm3, %v631_v58, %v633_v59  ;;  %v645_v29 = vsel %vm640_vm4, %v642_v61, %v644_v23  ;;  %v656_v57 = vsel %vm651_vm5, %v653_v62, %v655_v24  ;;  %v636_v17 = vsel %vm629_vm3, %v633_v59, %v635_v25  ;;  %v587_v51 = vpop.permute.xlu2 %586 }
 0x179   :  { %818 = vmatmul.f32.gmra.mxu1 %v634_v28  ;;  %853 = vmatmul.f32.gmra.mxu2 %v645_v29  ;;  %v647_v30 = vsel %vm640_vm4, %v644_v23, %v646_v26  ;;  %v658_v31 = vsel %vm651_vm5, %v655_v24, %v657_v27  ;;  %v605_v58 = vsel %vm598_vm0, %v179_v52, %v523_v48  ;;  %v2401_v23 = vld [vmem:[%s2888_s4] ss:$0 sm:$0xff] }
 0x17a   :  { %888 = vmatmul.f32.gmra.mxu3 %v656_v57  ;;  %v525_v60 = vpop.permute.xlu0 %524 }
 0x17b   :  { %v606_v10 = vsel %vm598_vm0, %v180_v9, %v525_v60 }
 0x17c   :  { %786 = vmatmul.f32.gmra.mxu0 %v619_v21 }
 0x180   :  { %v589_v63 = vpop.permute.xlu2 %588 }
 0x181   :  { %821 = vmatmul.f32.gmra.mxu1 %v636_v17  ;;  %856 = vmatmul.f32.gmra.mxu2 %v647_v30 }
 0x182   :  { %891 = vmatmul.f32.gmra.mxu3 %v658_v31  ;;  %v1461_v42 = vpop.permute.xlu1 %1460 }
 0x183   :  { %v1463_v43 = vunpack.i.h.bf16 %v1461_v42  ;;  %v1462_v44 = vunpack.i.l.bf16 %v1461_v42 }
 0x185   :  { %v613_v49 = vsel %vm607_vm1, %v604_v46, %v1463_v43  ;;  %v612_v32 = vsel %vm607_vm1, %v603_v45, %v1462_v44 }
 0x186   :  { %v622_v35 = vsel %vm616_vm2, %v613_v49, %v1468_v47  ;;  %v621_v1 = vsel %vm616_vm2, %v612_v32, %v1467_v22 }
 0x187   :  { %789 = vmatmul.f32.gmra.mxu0 %v621_v1  ;;  %v666_v7 = vrot.slane %v621_v1, 1  ;;  %v667_v37 = vrot.slane %v622_v35, 1  ;;  %v676_v33 = vrot.slane %v621_v1, 5  ;;  %v677_v38 = vrot.slane %v622_v35, 5 }
 0x188   :  { %v686_v53 = vrot.slane %v621_v1, 6  ;;  %v687_v54 = vrot.slane %v622_v35, 6 }
 0x189   :  { %v668_v55 = vsel %vm629_vm3, %v666_v7, %v667_v37  ;;  %v678_v56 = vsel %vm640_vm4, %v676_v33, %v677_v38 }
 0x18a   :  { %v555_v61 = vpop.permute.xlu1 %554  ;;  %824 = vmatmul.f32.gmra.mxu1 %v668_v55  ;;  %859 = vmatmul.f32.gmra.mxu2 %v678_v56  ;;  %v688_v62 = vsel %vm651_vm5, %v686_v53, %v687_v54  ;;  %v1019_v55 = vld [vmem:[%s2889_s5 + $0x78] sm:$0xff] }
 0x18b   :  { %v614_v0 = vsel %vm607_vm1, %v605_v58, %v555_v61  ;;  %894 = vmatmul.f32.gmra.mxu3 %v688_v62  ;;  %v1051_v56 = vld [vmem:[%s2889_s5 + $0x178] sm:$0xff]  ;;  %1084 = vmatpush.msrb.mxu0 %v1019_v55  ;;  %v1018_v61 = vld [vmem:[%s2889_s5 + $0x70] sm:$0xff] }
 0x18c   :  { %v623_v2 = vsel %vm616_vm2, %v614_v0, %v587_v51  ;;  %v1035_v58 = vld [vmem:[%s2889_s5 + $0xf8] sm:$0xff]  ;;  %1130 = vmatpush.msrb.mxu2 %v1051_v56  ;;  %v1050_v62 = vld [vmem:[%s2889_s5 + $0x170] sm:$0xff] }
 0x18d   :  { %v669_v3 = vrot.slane %v623_v2, 1  ;;  %v679_v13 = vrot.slane %v623_v2, 5  ;;  %v689_v4 = vrot.slane %v623_v2, 6  ;;  %v1034_v0 = vld [vmem:[%s2889_s5 + $0xf0] sm:$0xff]  ;;  %1107 = vmatpush.msrb.mxu1 %v1035_v58  ;;  %1085 = vmatpush.msrb.mxu0 %v1018_v61 }
 0x18e   :  { %1131 = vmatpush.msrb.mxu2 %v1050_v62  ;;  %v1026_v56 = vld [vmem:[%s2889_s5 + $0xb0] sm:$0xff] }
 0x18f   :  { %792 = vmatmul.f32.gmra.mxu0 %v622_v35  ;;  %v670_v5 = vsel %vm629_vm3, %v667_v37, %v669_v3  ;;  %v680_v6 = vsel %vm640_vm4, %v677_v38, %v679_v13  ;;  %v690_v8 = vsel %vm651_vm5, %v687_v54, %v689_v4  ;;  %1108 = vmatpush.msrb.mxu1 %v1034_v0 }
 0x192   :  { %v557_v11 = vpop.permute.xlu1 %556  ;;  %827 = vmatmul.f32.gmra.mxu1 %v670_v5  ;;  %862 = vmatmul.f32.gmra.mxu2 %v680_v6 }
 0x193   :  { %v615_v12 = vsel %vm607_vm1, %v606_v10, %v557_v11  ;;  %897 = vmatmul.f32.gmra.mxu3 %v690_v8  ;;  %v1033_v8 = vld [vmem:[%s2889_s5 + $0xe8] sm:$0xff]  ;;  %v1016_v10 = vld [vmem:[%s2889_s5 + $0x60] sm:$0xff] }
 0x194   :  { %v624_v15 = vsel %vm616_vm2, %v615_v12, %v589_v63  ;;  %v1048_v11 = vld [vmem:[%s2889_s5 + $0x160] sm:$0xff]  ;;  %v1067_v12 = vld [vmem:[%s2889_s5 + $0x1f8] sm:$0xff]  ;;  %1109 = vmatpush.msrb.mxu1 %v1033_v8 }
 0x195   :  { %v671_v16 = vrot.slane %v624_v15, 1  ;;  %v681_v14 = vrot.slane %v624_v15, 5  ;;  %v691_v18 = vrot.slane %v624_v15, 6  ;;  %1153 = vmatpush.msrb.mxu3 %v1067_v12 }
 0x197   :  { %795 = vmatmul.f32.gmra.mxu0 %v623_v2  ;;  %v672_v21 = vsel %vm629_vm3, %v669_v3, %v671_v16  ;;  %v682_v50 = vsel %vm640_vm4, %v679_v13, %v681_v14  ;;  %v692_v19 = vsel %vm651_vm5, %v689_v4, %v691_v18  ;;  %v1017_v13 = vld [vmem:[%s2889_s5 + $0x68] sm:$0xff]  ;;  %v1032_v18 = vld [vmem:[%s2889_s5 + $0xe0] sm:$0xff] }
 0x198   :  { %v1049_v4 = vld [vmem:[%s2889_s5 + $0x168] sm:$0xff]  ;;  %1086 = vmatpush.msrb.mxu0 %v1017_v13  ;;  %1110 = vmatpush.msrb.mxu1 %v1032_v18 }
 0x199   :  { %1132 = vmatpush.msrb.mxu2 %v1049_v4  ;;  %v1041_v4 = vld [vmem:[%s2889_s5 + $0x128] sm:$0xff] }
 0x19a   :  { %830 = vmatmul.f32.gmra.mxu1 %v672_v21  ;;  %865 = vmatmul.f32.gmra.mxu2 %v682_v50 }
 0x19b   :  { %900 = vmatmul.f32.gmra.mxu3 %v692_v19  ;;  %v1015_v19 = vld [vmem:[%s2889_s5 + $0x58] sm:$0xff]  ;;  %1087 = vmatpush.msrb.mxu0 %v1016_v10 }
 0x19c   :  { %1133 = vmatpush.msrb.mxu2 %v1048_v11 }
 0x19d   :  { %1088 = vmatpush.msrb.mxu0 %v1015_v19  ;;  %v1024_v19 = vld [vmem:[%s2889_s5 + $0xa0] sm:$0xff] }
 0x1e9   :  { %v781_v59 = vpop.f32.mrf.mxu0 }
 0x1ea   :  { %v782_v25 = vadd.f32 %v2401_v23, %v781_v59  ;;  %v1047_v59 = vld [vmem:[%s2889_s5 + $0x158] sm:$0xff] }
 0x1eb   :  { %1134 = vmatpush.msrb.mxu2 %v1047_v59 }
 0x1ec   :  { %v816_v24 = vpop.f32.mrf.mxu1 }
 0x1ed   :  { %v817_v28 = vadd.f32 %v816_v24, %v782_v25  ;;  %v1066_v24 = vld [vmem:[%s2889_s5 + $0x1f0] sm:$0xff] }
 0x1ee   :  { %1154 = vmatpush.msrb.mxu3 %v1066_v24  ;;  %v1007_v24 = vld [vmem:[%s2889_s5 + $0x18] sm:$0xff] }
 0x1f1   :  { %v784_v26 = vpop.f32.mrf.mxu0 }
 0x1f2   :  { %v785_v30 = vadd.f32 %v2401_v23, %v784_v26  ;;  %v1031_v26 = vld [vmem:[%s2889_s5 + $0xd8] sm:$0xff] }
 0x1f3   :  { %v851_v27 = vpop.f32.mrf.mxu2  ;;  %v886_v29 = vpop.f32.mrf.mxu3  ;;  %1111 = vmatpush.msrb.mxu1 %v1031_v26  ;;  %v1039_v26 = vld [vmem:[%s2889_s5 + $0x118] sm:$0xff] }
 0x1f4   :  { %v852_v57 = vadd.f32 %v851_v27, %v817_v28  ;;  %v1014_v27 = vld [vmem:[%s2889_s5 + $0x50] sm:$0xff] }
 0x1f5   :  { %v1046_v28 = vld [vmem:[%s2889_s5 + $0x150] sm:$0xff]  ;;  %1089 = vmatpush.msrb.mxu0 %v1014_v27  ;;  %v1023_v27 = vld [vmem:[%s2889_s5 + $0x98] sm:$0xff] }
 0x1f6   :  { %v819_v17 = vpop.f32.mrf.mxu1  ;;  %v887_v31 = vadd.f32 %v886_v29, %v852_v57  ;;  %v1065_v29 = vld [vmem:[%s2889_s5 + $0x1e8] sm:$0xff]  ;;  %v1030_v57 = vld [vmem:[%s2889_s5 + $0xd0] sm:$0xff]  ;;  %1135 = vmatpush.msrb.mxu2 %v1046_v28 }
 0x1f7   :  { %v820_v34 = vadd.f32 %v819_v17, %v785_v30  ;;  %v1013_v30 = vld [vmem:[%s2889_s5 + $0x48] sm:$0xff]  ;;  %1155 = vmatpush.msrb.mxu3 %v1065_v29  ;;  %1112 = vmatpush.msrb.mxu1 %v1030_v57  ;;  %v1006_v29 = vld [vmem:[%s2889_s5 + $0x10] sm:$0xff] }
 0x1f8   :  { %v2405_v41 = vmax.f32 %v887_v31, 0.0  ;;  %v1045_v31 = vld [vmem:[%s2889_s5 + $0x148] sm:$0xff]  ;;  %1090 = vmatpush.msrb.mxu0 %v1013_v30  ;;  %v1038_v30 = vld [vmem:[%s2889_s5 + $0x110] sm:$0xff] }
 0x1f9   :  { %v787_v36 = vpop.f32.mrf.mxu0  ;;  %1136 = vmatpush.msrb.mxu2 %v1045_v31  ;;  %v1022_v31 = vld [vmem:[%s2889_s5 + $0x90] sm:$0xff] }
 0x1fa   :  { %v788_v44 = vadd.f32 %v2401_v23, %v787_v36  ;;  %v912_v46 = vrot.slane %v2405_v41, 1  ;;  %v934_v48 = vrot.slane %v2405_v41, 7  ;;  %v923_v62 = vrot.slane %v2405_v41, 5 }
 0x1fc   :  { %v854_v39 = vpop.f32.mrf.mxu2 }
 0x1fd   :  { %v855_v40 = vadd.f32 %v854_v39, %v820_v34  ;;  %v889_v20 = vpop.f32.mrf.mxu3  ;;  %v1064_v34 = vld [vmem:[%s2889_s5 + $0x1e0] sm:$0xff]  ;;  %v1029_v39 = vld [vmem:[%s2889_s5 + $0xc8] sm:$0xff] }
 0x1fe   :  { %v822_v42 = vpop.f32.mrf.mxu1  ;;  %1156 = vmatpush.msrb.mxu3 %v1064_v34  ;;  %1113 = vmatpush.msrb.mxu1 %v1029_v39 }
 0x1ff   :  { %v890_v43 = vadd.f32 %v889_v20, %v855_v40  ;;  %v823_v47 = vadd.f32 %v822_v42, %v788_v44  ;;  %v1012_v42 = vld [vmem:[%s2889_s5 + $0x40] sm:$0xff]  ;;  %v1063_v44 = vld [vmem:[%s2889_s5 + $0x1d8] sm:$0xff] }
 0x200   :  { %1157 = vmatpush.msrb.mxu3 %v1063_v44  ;;  %1091 = vmatpush.msrb.mxu0 %v1012_v42 }
 0x201   :  { %v2408_v45 = vmax.f32 %v890_v43, 0.0  ;;  %v1044_v43 = vld [vmem:[%s2889_s5 + $0x140] sm:$0xff] }
 0x202   :  { %1137 = vmatpush.msrb.mxu2 %v1044_v43 }
 0x203   :  { %v913_v22 = vrot.slane %v2408_v45, 1  ;;  %v935_v49 = vrot.slane %v2408_v45, 7  ;;  %v920_v60 = vrot.slane %v2408_v45, 2  ;;  %v952_v5 = vrot.slane %v2408_v45, 4 }
 0x204   :  { %v790_v32 = vpop.f32.mrf.mxu0  ;;  %v857_v35 = vpop.f32.mrf.mxu2  ;;  %v945_v58 = vrot.slane %v2408_v45, 3 }
 0x205   :  { %v858_v1 = vadd.f32 %v857_v35, %v823_v47  ;;  %v892_v7 = vpop.f32.mrf.mxu3  ;;  %v914_v37 = vsel %vm629_vm3, %v912_v46, %v913_v22  ;;  %v936_v33 = vsel %vm933_vm6, %v934_v48, %v935_v49  ;;  %v791_v53 = vadd.f32 %v2401_v23, %v790_v32  ;;  %v1028_v22 = vld [vmem:[%s2889_s5 + $0xc0] sm:$0xff]  ;;  %v1062_v48 = vld [vmem:[%s2889_s5 + $0x1d0] sm:$0xff]  ;;  %v1011_v32 = vld [vmem:[%s2889_s5 + $0x38] sm:$0xff] }
 0x206   :  { %v1469_v38 = vpack.i.bf16 %v936_v33, %v914_v37  ;;  %v1043_v35 = vld [vmem:[%s2889_s5 + $0x138] sm:$0xff]  ;;  %v1061_v33 = vld [vmem:[%s2889_s5 + $0x1c8] sm:$0xff]  ;;  %1114 = vmatpush.msrb.mxu1 %v1028_v22  ;;  %1158 = vmatpush.msrb.mxu3 %v1062_v48 }
 0x207   :  { %v893_v51 = vadd.f32 %v892_v7, %v858_v1  ;;  %v825_v52 = vpop.f32.mrf.mxu1  ;;  %v1027_v37 = vld [vmem:[%s2889_s5 + $0xb8] sm:$0xff]  ;;  %1092 = vmatpush.msrb.mxu0 %v1011_v32  ;;  %1138 = vmatpush.msrb.mxu2 %v1043_v35  ;;  %v1005_v22 = vld [vmem:[%s2889_s5 + $0x8] sm:$0xff]  ;;  %v1060_v35 = vld [vmem:[%s2889_s5 + $0x1c0] sm:$0xff] }
 0x208   :  { %1470 = vrot.lane.b32.xlu0 %v1469_v38, %s1533_s2  ;;  %v826_v9 = vadd.f32 %v825_v52, %v791_v53  ;;  %v1010_v52 = vld [vmem:[%s2889_s5 + $0x30] sm:$0xff]  ;;  %1115 = vmatpush.msrb.mxu1 %v1027_v37  ;;  %v1037_v48 = vld [vmem:[%s2889_s5 + $0x108] sm:$0xff]  ;;  %v1020_v37 = vld [vmem:[%s2889_s5 + $0x80] sm:$0xff] }
 0x209   :  { %v2418_v54 = vmax.f32 %v893_v51, 0.0  ;;  %v924_v51 = vrot.slane %v2408_v45, 5  ;;  %1159 = vmatpush.msrb.mxu3 %v1061_v33  ;;  %1093 = vmatpush.msrb.mxu0 %v1010_v52  ;;  %v1021_v32 = vld [vmem:[%s2889_s5 + $0x88] sm:$0xff]  ;;  %v1059_v33 = vld [vmem:[%s2889_s5 + $0x1b8] sm:$0xff]  ;;  %v1056_v52 = vld [vmem:[%s2889_s5 + $0x1a0] sm:$0xff] }
 0x20a   :  { %1116 = vmatpush.msrb.mxu1 %v1026_v56  ;;  %v1074_v56 = vld [vmem:[%s2889_s5 + $0x230] sm:$0xff] }
 0x20b   :  { %v941_v2 = vrot.slane %v2418_v54, 2  ;;  %v953_v3 = vrot.slane %v2418_v54, 4  ;;  %v946_v53 = vrot.slane %v2418_v54, 3  ;;  %v1009_v54 = vld [vmem:[%s2889_s5 + $0x28] sm:$0xff]  ;;  %v925_v8 = vsel %vm640_vm4, %v923_v62, %v924_v51  ;;  %1160 = vmatpush.msrb.mxu3 %v1060_v35 }
 0x20c   :  { %v793_v6 = vpop.f32.mrf.mxu0  ;;  %1094 = vmatpush.msrb.mxu0 %v1009_v54  ;;  %v1057_v51 = vld [vmem:[%s2889_s5 + $0x1a8] sm:$0xff]  ;;  %v1052_v54 = vld [vmem:[%s2889_s5 + $0x180] sm:$0xff] }
 0x20d   :  { %v860_v63 = vpop.f32.mrf.mxu2  ;;  %v2463_v15 = vsel %vm918_vm8, %v920_v60, %v941_v2  ;;  %v2466_v16 = vsel %vm951_vm7, %v952_v5, %v953_v3  ;;  %v794_v25 = vadd.f32 %v2401_v23, %v793_v6  ;;  %v1025_v5 = vld [vmem:[%s2889_s5 + $0xa8] sm:$0xff]  ;;  %v947_v10 = vsel %vm944_vm9, %v945_v58, %v946_v53  ;;  %1161 = vmatpush.msrb.mxu3 %v1059_v33  ;;  %v1075_v53 = vld [vmem:[%s2889_s5 + $0x238] sm:$0xff]  ;;  %v1054_v58 = vld [vmem:[%s2889_s5 + $0x190] sm:$0xff] }
 0x20e   :  { %v895_v14 = vpop.f32.mrf.mxu3  ;;  %v861_v21 = vadd.f32 %v860_v63, %v826_v9  ;;  %v1008_v9 = vld [vmem:[%s2889_s5 + $0x20] sm:$0xff]  ;;  %1117 = vmatpush.msrb.mxu1 %v1025_v5  ;;  %v1053_v62 = vld [vmem:[%s2889_s5 + $0x188] sm:$0xff] }
 0x20f   :  { %v828_v50 = vpop.f32.mrf.mxu1  ;;  %1095 = vmatpush.msrb.mxu0 %v1008_v9 }
 0x210   :  { %v896_v17 = vadd.f32 %v895_v14, %v861_v21  ;;  %v829_v36 = vadd.f32 %v828_v50, %v794_v25  ;;  %v1040_v50 = vld [vmem:[%s2889_s5 + $0x120] sm:$0xff]  ;;  %1118 = vmatpush.msrb.mxu1 %v1024_v19 }
 0x211   :  { %1096 = vmatpush.msrb.mxu0 %v1007_v24 }
 0x212   :  { %v2523_v49 = vmax.f32 %v896_v17, 0.0  ;;  %1119 = vmatpush.msrb.mxu1 %v1023_v27 }
 0x213   :  { %1097 = vmatpush.msrb.mxu0 %v1006_v29 }
 0x214   :  { %v796_v40 = vpop.f32.mrf.mxu0  ;;  %v961_v61 = vrot.slane %v2523_v49, 1  ;;  %v981_v3 = vrot.slane %v2523_v49, 7  ;;  %v971_v57 = vrot.slane %v2523_v49, 5  ;;  %1120 = vmatpush.msrb.mxu1 %v1022_v31 }
 0x215   :  { %v863_v20 = vpop.f32.mrf.mxu2  ;;  %v797_v1 = vadd.f32 %v2401_v23, %v796_v40  ;;  %v1042_v23 = vld [vmem:[%s2889_s5 + $0x130] sm:$0xff]  ;;  %1098 = vmatpush.msrb.mxu0 %v1005_v22 }
 0x216   :  { %v864_v46 = vadd.f32 %v863_v20, %v829_v36  ;;  %v898_v47 = vpop.f32.mrf.mxu3  ;;  %1139 = vmatpush.msrb.mxu2 %v1042_v23  ;;  %1121 = vmatpush.msrb.mxu1 %v1021_v32  ;;  %v1055_v23 = vld [vmem:[%s2889_s5 + $0x198] sm:$0xff]  ;;  %v1244_v32 = vld [vmem:[%s2891_s7 + $0x48] sm:$0xff] }
 0x217   :  { %v831_v38 = vpop.f32.mrf.mxu1 }
 0x218   :  { %v899_v7 = vadd.f32 %v898_v47, %v864_v46  ;;  %v832_v0 = vadd.f32 %v831_v38, %v797_v1  ;;  %1140 = vmatpush.msrb.mxu2 %v1041_v4  ;;  %v1004_v1 = vld [vmem:[%s2889_s5] sm:$0xff]  ;;  %1122 = vmatpush.msrb.mxu1 %v1020_v37  ;;  %v1058_v38 = vld [vmem:[%s2889_s5 + $0x1b0] sm:$0xff]  ;;  %v1069_v4 = vld [vmem:[%s2889_s5 + $0x208] sm:$0xff] }
 0x219   :  { %1099 = vmatpush.msrb.mxu0 %v1004_v1  ;;  %1162 = vmatpush.msrb.mxu3 %v1058_v38 }
 0x21a   :  { %v2546_v55 = vmax.f32 %v899_v7, 0.0  ;;  %1141 = vmatpush.msrb.mxu2 %v1040_v50  ;;  %v1036_v7 = vld [vmem:[%s2889_s5 + $0x100] sm:$0xff] }
 0x21b   :  { %1163 = vmatpush.msrb.mxu3 %v1057_v51  ;;  %1184 = vmatpush.msra.mxu0 %v1075_v53  ;;  %v1242_v51 = vld [vmem:[%s2891_s7 + $0x38] sm:$0xff] }
 0x21c   :  { %v962_v2 = vrot.slane %v2546_v55, 1  ;;  %v982_v13 = vrot.slane %v2546_v55, 7  ;;  %v972_v25 = vrot.slane %v2546_v55, 5  ;;  %v991_v17 = vrot.slane %v2546_v55, 3  ;;  %1142 = vmatpush.msrb.mxu2 %v1039_v26 }
 0x21d   :  { %v866_v6 = vpop.f32.mrf.mxu2  ;;  %v968_v34 = vrot.slane %v2546_v55, 2  ;;  %v997_v20 = vrot.slane %v2546_v55, 4  ;;  %1164 = vmatpush.msrb.mxu3 %v1056_v52  ;;  %1185 = vmatpush.msra.mxu0 %v1074_v56  ;;  %v1241_v56 = vld [vmem:[%s2891_s7 + $0x30] sm:$0xff] }
 0x21e   :  { %v867_v63 = vadd.f32 %v866_v6, %v832_v0  ;;  %v963_v11 = vsel %vm629_vm3, %v961_v61, %v962_v2  ;;  %v983_v12 = vsel %vm933_vm6, %v981_v3, %v982_v13  ;;  %v901_v14 = vpop.f32.mrf.mxu3  ;;  %v973_v42 = vsel %vm640_vm4, %v971_v57, %v972_v25  ;;  %1143 = vmatpush.msrb.mxu2 %v1038_v30  ;;  %v1073_v61 = vld [vmem:[%s2889_s5 + $0x228] sm:$0xff]  ;;  %v1072_v0 = vld [vmem:[%s2889_s5 + $0x220] sm:$0xff]  ;;  %v1071_v2 = vld [vmem:[%s2889_s5 + $0x218] sm:$0xff] }
 0x21f   :  { %v1474_v18 = vpack.i.bf16 %v963_v11, %v947_v10  ;;  %v1479_v21 = vpack.i.bf16 %v983_v12, %v925_v8  ;;  %1165 = vmatpush.msrb.mxu3 %v1055_v23  ;;  %1186 = vmatpush.msra.mxu0 %v1073_v61  ;;  %v1070_v3 = vld [vmem:[%s2889_s5 + $0x210] sm:$0xff]  ;;  %v930_v13 = vrot.slane %v2408_v45, 6  ;;  %v929_v6 = vrot.slane %v2405_v41, 6  ;;  %v1240_v61 = vld [vmem:[%s2891_s7 + $0x28] sm:$0xff] }
 0x220   :  { %v902_v59 = vadd.f32 %v901_v14, %v867_v63  ;;  %1144 = vmatpush.msrb.mxu2 %v1037_v48  ;;  %v919_v10 = vrot.slane %v2405_v41, 2  ;;  %v1068_v14 = vld [vmem:[%s2889_s5 + $0x200] sm:$0xff]  ;;  %v977_v25 = vrot.slane %v2523_v49, 6  ;;  %v1245_v48 = vld [vmem:[%s2891_s7 + $0x50] sm:$0xff]  ;;  %s1361_s5 = sshll.u32 %s2895_s11, 4  ;;  %s1362_s5 = int_to_ptr.hbm [resolvable:$true] %s1361_s5 }
 0x221   :  { %1475 = vrot.lane.b32.xlu1 %v1474_v18, %s1533_s2  ;;  %1480 = vrot.lane.b32.xlu2 %v1479_v21, %s1533_s2  ;;  %v931_v12 = vsel %vm651_vm5, %v929_v6, %v930_v13  ;;  %v1238_v13 = vld [vmem:[%s2891_s7 + $0x18] sm:$0xff] }
 0x222   :  { %v909_v28 = vmax.f32 %v902_v59, 0.0  ;;  %1145 = vmatpush.msrb.mxu2 %v1036_v7  ;;  %1166 = vmatpush.msrb.mxu3 %v1054_v58  ;;  %v921_v50 = vsel %vm918_vm8, %v919_v10, %v920_v60  ;;  %v978_v59 = vrot.slane %v2546_v55, 6  ;;  %v1249_v55 = vld [vmem:[%s2891_s7 + $0x70] sm:$0xff]  ;;  %v1243_v7 = vld [vmem:[%s2891_s7 + $0x40] sm:$0xff] }
 0x223   :  { %1187 = vmatpush.msra.mxu0 %v1072_v0 }
 0x224   :  { %v988_v36 = vrot.slane %v909_v28, 2  ;;  %v992_v39 = vrot.slane %v909_v28, 3  ;;  %v998_v40 = vrot.slane %v909_v28, 4  ;;  %1167 = vmatpush.msrb.mxu3 %v1053_v62  ;;  %v979_v26 = vsel %vm651_vm5, %v977_v25, %v978_v59  ;;  %v1235_v59 = vld [vmem:[%s2891_s7] sm:$0xff]  ;;  %v1262_v25 = vld [vmem:[%s2891_s7 + $0xd8] sm:$0xff] }
 0x225   :  { %1188 = vmatpush.msra.mxu0 %v1071_v2  ;;  %v1239_v2 = vld [vmem:[%s2891_s7 + $0x20] sm:$0xff] }
 0x226   :  { %v993_v43 = vsel %vm944_vm9, %v991_v17, %v992_v39  ;;  %v2609_v44 = vsel %vm918_vm8, %v968_v34, %v988_v36  ;;  %v2612_v46 = vsel %vm951_vm7, %v997_v20, %v998_v40  ;;  %1168 = vmatpush.msrb.mxu3 %v1052_v54  ;;  %v967_v17 = vrot.slane %v2523_v49, 2  ;;  %v1247_v20 = vld [vmem:[%s2891_s7 + $0x60] sm:$0xff] }
 0x227   :  { %v1484_v47 = vpack.i.bf16 %v973_v42, %v993_v43  ;;  %1189 = vmatpush.msra.mxu0 %v1070_v3  ;;  %v1266_v42 = vld [vmem:[%s2891_s7 + $0xf8] sm:$0xff] }
 0x228   :  { %v969_v36 = vsel %vm918_vm8, %v967_v17, %v968_v34  ;;  %v1248_v34 = vld [vmem:[%s2891_s7 + $0x68] sm:$0xff]  ;;  %1291 = vmatpush.msra.mxu2 %v1266_v42  ;;  %v1253_v17 = vld [vmem:[%s2891_s7 + $0x90] sm:$0xff] }
 0x229   :  { %1485 = vrot.lane.b32.xlu0 %v1484_v47, %s1533_s2  ;;  %1190 = vmatpush.msra.mxu0 %v1069_v4 }
 0x22b   :  { %1191 = vmatpush.msra.mxu0 %v1068_v14 }
 0x27a   :  { %v1471_v5 = vpop.permute.xlu0 %1470 }
 0x27b   :  { %v1473_v8 = vunpack.i.h.bf16 %v1471_v5  ;;  %v1472_v9 = vunpack.i.l.bf16 %v1471_v5  ;;  %v1481_v63 = vpop.permute.xlu2 %1480 }
 0x27c   :  { %v1482_v11 = vunpack.i.l.bf16 %v1481_v63  ;;  %v1483_v24 = vunpack.i.h.bf16 %v1481_v63 }
 0x27d   :  { %v955_v18 = vsel %vm607_vm1, %v2405_v41, %v1472_v9  ;;  %v957_v21 = vsel %vm607_vm1, %v931_v12, %v1473_v8 }
 0x27e   :  { %1100 = vmatmul.f32.vlgmr.msrb.gmra.mxu0 %v955_v18  ;;  %1146 = vmatmul.f32.vlgmr.msrb.gmra.mxu2 %v957_v21  ;;  %v956_v19 = vsel %vm607_vm1, %v921_v50, %v1482_v11  ;;  %v1002_v41 = vsel %vm607_vm1, %v979_v26, %v1483_v24  ;;  %v1237_v18 = vld [vmem:[%s2891_s7 + $0x10] sm:$0xff]  ;;  %v1236_v50 = vld [vmem:[%s2891_s7 + $0x8] sm:$0xff]  ;;  %v1263_v24 = vld [vmem:[%s2891_s7 + $0xe0] sm:$0xff] }
 0x27f   :  { %1123 = vmatmul.f32.vlgmr.msrb.gmra.mxu1 %v956_v19  ;;  %v1265_v21 = vld [vmem:[%s2891_s7 + $0xf0] sm:$0xff]  ;;  %v1264_v19 = vld [vmem:[%s2891_s7 + $0xe8] sm:$0xff] }
 0x280   :  { %1292 = vmatpush.msra.mxu2 %v1265_v21  ;;  %v1261_v26 = vld [vmem:[%s2891_s7 + $0xd0] sm:$0xff] }
 0x282   :  { %1293 = vmatpush.msra.mxu2 %v1264_v19 }
 0x284   :  { %1294 = vmatpush.msra.mxu2 %v1263_v24 }
 0x286   :  { %1149 = vmatmul.f32.gmra.mxu2 %v1002_v41  ;;  %v1260_v41 = vld [vmem:[%s2891_s7 + $0xc8] sm:$0xff] }
 0x287   :  { %1295 = vmatpush.msra.mxu2 %v1262_v25 }
 0x289   :  { %1296 = vmatpush.msra.mxu2 %v1261_v26 }
 0x28b   :  { %1297 = vmatpush.msra.mxu2 %v1260_v41 }
 0x293   :  { %v1476_v27 = vpop.permute.xlu1 %1475 }
 0x294   :  { %v1478_v45 = vunpack.i.h.bf16 %v1476_v27  ;;  %v1477_v28 = vunpack.i.l.bf16 %v1476_v27  ;;  %v1259_v27 = vld [vmem:[%s2891_s7 + $0xc0] sm:$0xff] }
 0x295   :  { %1298 = vmatpush.msra.mxu2 %v1259_v27 }
 0x296   :  { %v1000_v60 = vsel %vm607_vm1, %v2523_v49, %v1478_v45  ;;  %v958_v29 = vsel %vm607_vm1, %v2463_v15, %v1477_v28  ;;  %v1250_v49 = vld [vmem:[%s2891_s7 + $0x78] sm:$0xff]  ;;  %v1257_v28 = vld [vmem:[%s2891_s7 + $0xb0] sm:$0xff] }
 0x297   :  { %1103 = vmatmul.f32.gmra.mxu0 %v1000_v60  ;;  %1169 = vmatmul.f32.vlgmr.msrb.gmra.mxu3 %v958_v29  ;;  %v1258_v45 = vld [vmem:[%s2891_s7 + $0xb8] sm:$0xff]  ;;  %v1256_v60 = vld [vmem:[%s2891_s7 + $0xa8] sm:$0xff]  ;;  %v1255_v29 = vld [vmem:[%s2891_s7 + $0xa0] sm:$0xff] }
 0x298   :  { %1271 = vmatpush.msra.mxu1 %v1250_v49  ;;  %1299 = vmatpush.msra.mxu2 %v1258_v45 }
 0x29a   :  { %1272 = vmatpush.msra.mxu1 %v1249_v55  ;;  %1300 = vmatpush.msra.mxu2 %v1257_v28 }
 0x29b   :  { %v1486_v57 = vpop.permute.xlu0 %1485 }
 0x29c   :  { %v1488_v30 = vunpack.i.h.bf16 %v1486_v57  ;;  %v1487_v31 = vunpack.i.l.bf16 %v1486_v57  ;;  %1273 = vmatpush.msra.mxu1 %v1248_v34  ;;  %1301 = vmatpush.msra.mxu2 %v1256_v60  ;;  %v1254_v57 = vld [vmem:[%s2891_s7 + $0x98] sm:$0xff] }
 0x29e   :  { %v1001_v39 = vsel %vm607_vm1, %v969_v36, %v1488_v30  ;;  %v1003_v40 = vsel %vm607_vm1, %v2609_v44, %v1487_v31  ;;  %1274 = vmatpush.msra.mxu1 %v1247_v20  ;;  %1302 = vmatpush.msra.mxu2 %v1255_v29  ;;  %v1252_v30 = vld [vmem:[%s2891_s7 + $0x88] sm:$0xff]  ;;  %v1251_v31 = vld [vmem:[%s2891_s7 + $0x80] sm:$0xff] }
 0x29f   :  { %1126 = vmatmul.f32.gmra.mxu1 %v1001_v39  ;;  %1172 = vmatmul.f32.gmra.mxu3 %v1003_v40 }
 0x2a0   :  { %1418 = vmatmul.msk.f32.vlgmr.msra.gmra.mxu0 %vm607_vm1, %v2466_v16  ;;  %v1501_v16 = vld [vmem:[%s2890_s6] ss:$0 sm:$0xff]  ;;  %1303 = vmatpush.msra.mxu2 %v1254_v57 }
 0x2a2   :  { %1304 = vmatpush.msra.mxu2 %v1253_v17 }
 0x2a4   :  { %1305 = vmatpush.msra.mxu2 %v1252_v30 }
 0x2a6   :  { %1306 = vmatpush.msra.mxu2 %v1251_v31 }
 0x2a8   :  { %1419 = vmatmul.msk.f32.gmra.mxu0 %vm607_vm1, %v2612_v46  ;;  %v1246_v46 = vld [vmem:[%s2891_s7 + $0x58] sm:$0xff] }
 0x2a9   :  { %1275 = vmatpush.msra.mxu1 %v1246_v46 }
 0x2ab   :  { %1276 = vmatpush.msra.mxu1 %v1245_v48 }
 0x2ad   :  { %1277 = vmatpush.msra.mxu1 %v1244_v32  ;;  %v1327_v32 = vld [vmem:[%s2893_s9 + $0x78] sm:$0xff] }
 0x2ae   :  { %1332 = vmatpush.msra.mxu3 %v1327_v32 }
 0x2af   :  { %1278 = vmatpush.msra.mxu1 %v1243_v7  ;;  %v1324_v7 = vld [vmem:[%s2893_s9 + $0x60] sm:$0xff] }
 0x2b1   :  { %1279 = vmatpush.msra.mxu1 %v1242_v51  ;;  %v1320_v51 = vld [vmem:[%s2893_s9 + $0x40] sm:$0xff] }
 0x2b3   :  { %1280 = vmatpush.msra.mxu1 %v1241_v56  ;;  %v1316_v56 = vld [vmem:[%s2893_s9 + $0x20] sm:$0xff] }
 0x2b5   :  { %1281 = vmatpush.msra.mxu1 %v1240_v61  ;;  %v1314_v61 = vld [vmem:[%s2893_s9 + $0x10] sm:$0xff] }
 0x2b7   :  { %1282 = vmatpush.msra.mxu1 %v1239_v2 }
 0x2b9   :  { %1283 = vmatpush.msra.mxu1 %v1238_v13 }
 0x2bb   :  { %1284 = vmatpush.msra.mxu1 %v1237_v18 }
 0x2bd   :  { %1285 = vmatpush.msra.mxu1 %v1236_v50 }
 0x2bf   :  { %1286 = vmatpush.msra.mxu1 %v1235_v59 }
 0x2fb   :  { %v1101_v15 = vpop.f32.mrf.mxu0 }
 0x2fc   :  { %v1124_v43 = vpop.f32.mrf.mxu1  ;;  %v1102_v47 = vadd.f32 %v1501_v16, %v1101_v15 }
 0x2fe   :  { %v1125_v35 = vadd.f32 %v1124_v43, %v1102_v47 }
 0x301   :  { %v1147_v22 = vpop.f32.mrf.mxu2 }
 0x302   :  { %v1148_v33 = vadd.f32 %v1147_v22, %v1125_v35  ;;  %v1326_v35 = vld [vmem:[%s2893_s9 + $0x70] sm:$0xff] }
 0x303   :  { %1333 = vmatpush.msra.mxu3 %v1326_v35 }
 0x309   :  { %v1150_v58 = vpop.f32.mrf.mxu2 }
 0x314   :  { %v1104_v44 = vpop.f32.mrf.mxu0 }
 0x315   :  { %v1105_v37 = vadd.f32 %v1501_v16, %v1104_v44 }
 0x31a   :  { %v1170_v1 = vpop.f32.mrf.mxu3 }
 0x31b   :  { %v1171_v53 = vadd.f32 %v1170_v1, %v1148_v33  ;;  %v1325_v1 = vld [vmem:[%s2893_s9 + $0x68] sm:$0xff]  ;;  %v1322_v33 = vld [vmem:[%s2893_s9 + $0x50] sm:$0xff] }
 0x31c   :  { %v1127_v38 = vpop.f32.mrf.mxu1  ;;  %1334 = vmatpush.msra.mxu3 %v1325_v1 }
 0x31d   :  { %v1128_v52 = vadd.f32 %v1127_v38, %v1105_v37  ;;  %v1193_v23 = vpop.f32.mrf.mxu0  ;;  %v1323_v37 = vld [vmem:[%s2893_s9 + $0x58] sm:$0xff]  ;;  %v1321_v38 = vld [vmem:[%s2893_s9 + $0x48] sm:$0xff] }
 0x31e   :  { %v1194_v54 = vadd.f32 %v1193_v23, %v1171_v53  ;;  %1335 = vmatpush.msra.mxu3 %v1324_v7  ;;  %v1318_v23 = vld [vmem:[%s2893_s9 + $0x30] sm:$0xff]  ;;  %v1317_v53 = vld [vmem:[%s2893_s9 + $0x28] sm:$0xff] }
 0x31f   :  { %v1151_v62 = vadd.f32 %v1150_v58, %v1128_v52  ;;  %v1319_v52 = vld [vmem:[%s2893_s9 + $0x38] sm:$0xff] }
 0x320   :  { %v2759_v5 = vmax.f32 %v1194_v54, 0.0  ;;  %1336 = vmatpush.msra.mxu3 %v1323_v37  ;;  %v1315_v58 = vld [vmem:[%s2893_s9 + $0x18] sm:$0xff]  ;;  %v1312_v54 = vld [vmem:[%s2893_s9] sm:$0xff] }
 0x322   :  { %v1173_v0 = vpop.f32.mrf.mxu3  ;;  %v1208_v9 = vrot.slane %v2759_v5, 6  ;;  %v1202_v10 = vrot.slane %v2759_v5, 1  ;;  %v1206_v44 = vrot.slane %v2759_v5, 5  ;;  %1337 = vmatpush.msra.mxu3 %v1322_v33 }
 0x323   :  { %v1174_v3 = vadd.f32 %v1173_v0, %v1151_v62  ;;  %v1313_v62 = vld [vmem:[%s2893_s9 + $0x8] sm:$0xff]  ;;  %v1502_v0 = vld [vmem:[%s2892_s8] ss:$0 sm:$0xff]  ;;  %s1359_s9 = sshll.u32 %s1535_s24, 4  ;;  %s1360_s9 = int_to_ptr.vmem [resolvable:$true] %s1359_s9 }
 0x324   :  { %1338 = vmatpush.msra.mxu3 %v1321_v38 }
 0x325   :  { %v1196_v4 = vpop.f32.mrf.mxu0 }
 0x326   :  { %v1197_v6 = vadd.f32 %v1196_v4, %v1174_v3  ;;  %1339 = vmatpush.msra.mxu3 %v1320_v51 }
 0x328   :  { %v1200_v8 = vmax.f32 %v1197_v6, 0.0  ;;  %1340 = vmatpush.msra.mxu3 %v1319_v52  ;;  %v1503_v6 = vld [vmem:[%s2894_s10] ss:$0 sm:$0xff] }
 0x32a   :  { %v1221_v63 = vrot.slane %v1200_v8, 6  ;;  %v1215_v11 = vrot.slane %v1200_v8, 1  ;;  %v1219_v20 = vrot.slane %v1200_v8, 5  ;;  %1341 = vmatpush.msra.mxu3 %v1318_v23 }
 0x32c   :  { %v1489_v12 = vpack.i.bf16 %v1208_v9, %v1221_v63  ;;  %v1494_v14 = vpack.i.bf16 %v1202_v10, %v1215_v11  ;;  %1342 = vmatpush.msra.mxu3 %v1317_v53 }
 0x32e   :  { %1490 = vrot.lane.b32.xlu1 %v1489_v12, %s1533_s2  ;;  %1495 = vrot.lane.b32.xlu2 %v1494_v14, %s1533_s2 }
 0x32f   :  { %1343 = vmatpush.msra.mxu3 %v1316_v56 }
 0x331   :  { %1344 = vmatpush.msra.mxu3 %v1315_v58 }
 0x333   :  { %1345 = vmatpush.msra.mxu3 %v1314_v61 }
 0x335   :  { %1346 = vmatpush.msra.mxu3 %v1313_v62 }
 0x337   :  { %1347 = vmatpush.msra.mxu3 %v1312_v54 }
 0x388   :  { %v1496_v36 = vpop.permute.xlu2 %1495 }
 0x389   :  { %v1498_v39 = vunpack.i.h.bf16 %v1496_v36  ;;  %v1497_v40 = vunpack.i.l.bf16 %v1496_v36 }
 0x38b   :  { %v1225_v15 = vsel %vm607_vm1, %v1200_v8, %v1497_v40  ;;  %v1212_v55 = vsel %vm607_vm1, %v2759_v5, %v1498_v39 }
 0x38c   :  { %v1229_v49 = vrot.slane %v1225_v15, 7 }
 0x38e   :  { %v1233_v34 = vsel %vm933_vm6, %v1212_v55, %v1229_v49 }
 0x38f   :  { %1287 = vmatmul.f32.vlgmr.msra.gmra.mxu1 %v1233_v34 }
 0x3a0   :  { %v1491_v16 = vpop.permute.xlu1 %1490 }
 0x3a1   :  { %v1493_v42 = vunpack.i.h.bf16 %v1491_v16  ;;  %v1492_v43 = vunpack.i.l.bf16 %v1491_v16 }
 0x3a3   :  { %v1226_v46 = vsel %vm607_vm1, %v1219_v20, %v1492_v43  ;;  %v1213_v22 = vsel %vm607_vm1, %v1206_v44, %v1493_v42 }
 0x3a4   :  { %v1230_v47 = vrot.slane %v1226_v46, 7 }
 0x3a6   :  { %v1234_v48 = vsel %vm933_vm6, %v1213_v22, %v1230_v47 }
 0x3a7   :  { %1307 = vmatmul.f32.vlgmr.msra.gmra.mxu2 %v1234_v48 }
 0x40c   :  { %v1288_v2 = vpop.f32.mrf.mxu1 }
 0x40d   :  { %v1289_v3 = vadd.f32 %v1502_v0, %v1288_v2 }
 0x42a   :  { %v1308_v13 = vpop.f32.mrf.mxu2 }
 0x42b   :  { %v1309_v4 = vadd.f32 %v1308_v13, %v1289_v3 }
 0x42d   :  { %v1311_v5 = vmax.f32 %v1309_v4, 0.0 }
 0x42f   :  { %1348 = vmatmul.f32.vlgmr.msra.gmra.mxu3 %v1311_v5 }
 0x4b2   :  { %v1349_v8 = vpop.f32.mrf.mxu3 }
 0x4b3   :  { %v1350_v9 = vadd.f32 %v1503_v6, %v1349_v8 }
 0x4b5   :  { %1504 = vtanh.f32 %v1350_v9 }
 0x4bb   :  { %v1505_v63 = vpop.eup %1504 }
 0x4bc   :  { %1353 = vst [vmem:[#allocation2] sm:$0x3] %v1505_v63 }
 0x4bd   :  { %1364 = dma.vmem_to_hbm [thread:$0]  %s1360_s9, 32, %s1362_s5, [#allocation3]  }
 0x4be   :  { %1530 = dma.done.wait [#allocation3], 32  }
 0x4bf   :  { %1531 = vsyncadd [#allocation3], 4294967264 }
 0x4c0   :  { %1369 = vsyncpa [#allocation3], 1 }

</bundles_post_ra>
